<compile_context>
chip_gen: v7x
topology: tpu7x:2x2x1
jax: 0.10.0
libtpu: 0.0.40
codegen_flags: <defaults>
</compile_context>

<pallas_src>
import functools

import numpy as np

import jax
import jax.numpy as jnp
from jax import lax
from jax.experimental import pallas as pl
from jax.experimental.pallas import tpu as pltpu

EPS = 1e-5


def _vmem_budgets():
    """Generation-aware scoped-VMEM limit and per-tile working-set budget."""
    try:
        cap = int(pltpu.get_tpu_info().vmem_capacity_bytes)
    except Exception:
        cap = 64 * 1024 * 1024  # conservative (v7x per-TC VMEM)
    limit = min((cap * 3) // 4, 96 * 1024 * 1024)
    tile_budget = min(cap // 4, 24 * 1024 * 1024)
    return limit, tile_budget


def _pick_td(D, H, W, Cin, Cout, tile_budget):
    """Depth-planes per tile: TM = td*H*W, td | D preferred, TM % 128 == 0,
    TM >= halo (2*H*W + 2*W + 2), working set within the VMEM tile budget."""
    HW = H * W
    halo = 2 * HW + 2 * W + 2
    td_min = -(-halo // HW)  # ceil
    # rough f32 per-plane working set: cur+nxt (double-buffered), conv out
    # (double-buffered), xx concat, fused-K col scratch, conv value, pos table.
    per_plane = int(1.5 * 4 * HW * (4 * Cin + 2 * Cout + 2 * Cin + 27 * Cin + Cout + 4))
    td_budget = max(tile_budget // max(per_plane, 1), td_min)
    for td in range(min(D, int(td_budget)), 0, -1):
        if D % td == 0 and td >= td_min and (td * HW) % 128 == 0:
            return td
    # Fallback: pad D up to a multiple of the smallest lane-aligned td.
    td = td_min
    while (td * HW) % 128 != 0 and td <= max(int(td_budget), td_min) + 128:
        td += 1
    if (td * HW) % 128 != 0:
        # TODO(synk): support plane sizes H*W with no small 128-lane-aligned multiple.
        raise NotImplementedError("H*W incompatible with 128-lane tiling")
    return td


def _conv_stats_kernel(x_cur_ref, x_nxt_ref, w_ref, pos_ref,
                       conv_ref, sum_ref, sq_ref, col_ref,
                       *, Cin, H, W, HW, TM, M):
    """Pass 1: in-VMEM im2col assembly + single fused-K MXU contraction +
    per-channel sum / sum-of-squares (resident across the m axis).

    x_cur_ref: (1, Cin, TM)   flat input tile m
    x_nxt_ref: (1, Cin, TM)   flat input tile m+1 (halo source)
    w_ref    : (Cout, K=27*Cin) flattened conv weight (kd,kh,kw,ci ordering)
    pos_ref  : (2, TM) int32  per-column (h, w) coordinates (tile-invariant)
    conv_ref : (1, Cout, TM)  conv output tile (lane-dense)
    sum_ref  : (1, Cout, 1)   per-(n, channel) running sum
    sq_ref   : (1, Cout, 1)   per-(n, channel) running sum of squares
    col_ref  : (K, TM) f32    scratch: fused-K im2col tile
    """
    m = pl.program_id(1)

    @pl.when(m == 0)
    def _init():
        sum_ref[...] = jnp.zeros_like(sum_ref)
        sq_ref[...] = jnp.zeros_like(sq_ref)

    # Halo'd window of the flat input: columns [m*TM, m*TM + 2*TM).
    xx = jnp.concatenate([x_cur_ref[0], x_nxt_ref[0]], axis=-1)  # (Cin, 2*TM)

    h_idx = pos_ref[0:1, :]  # (1, TM) int32
    w_idx = pos_ref[1:2, :]  # (1, TM) int32

    # Assemble the fused-K im2col tile: tap (kd,kh,kw) of output column o is
    # xx[:, o_local + kd*HW + kh*W + kw]; taps crossing the H/W boundaries are
    # masked to zero (that is exactly what Conv3d padding=1 contributes).
    for kd in range(3):
        for kh in range(3):
            hv = h_idx + (kh - 1)
            h_ok = (hv >= 0) & (hv < H)
            for kw in range(3):
                wv = w_idx + (kw - 1)
                ok = h_ok & (wv >= 0) & (wv < W)          # (1, TM)
                t = (kd * 3 + kh) * 3 + kw
                lo = kd * HW + kh * W + kw                # static lane offset
                tap = xx[:, lo:lo + TM]                   # (Cin, TM)
                col_ref[t * Cin:(t + 1) * Cin, :] = jnp.where(ok, tap, 0.0)

    # One MXU contraction: (Cout, K) @ (K, TM) -> (Cout, TM).
    conv = jnp.dot(w_ref[...], col_ref[...], preferred_element_type=jnp.float32)

    # Zero padded-tail columns (o >= M) so they neither bias the statistics
    # nor leave garbage in the (later sliced-away) output.
    o = m * TM + lax.broadcasted_iota(jnp.int32, (1, TM), 1)
    conv = jnp.where(o < M, conv, 0.0)

    conv_ref[0] = conv
    sum_ref[0] += jnp.sum(conv, axis=-1, keepdims=True)
    sq_ref[0] += jnp.sum(conv * conv, axis=-1, keepdims=True)


def _bn_relu_kernel(conv_ref, scale_ref, shift_ref, o_ref):
    """Pass 2: in-place y = relu(conv * scale + shift) over lane-dense tiles."""
    o_ref[0] = jnp.maximum(conv_ref[0] * scale_ref[...] + shift_ref[...], 0.0)


@jax.jit
def single_conv(x_ncdhw, w_oidhw, b, gamma, beta):
    """x_ncdhw: (N, Cin, D, H, W) f32 -> (N, Cout, D, H, W) f32."""
    del b  # Conv3d bias cancels exactly under training-mode BatchNorm.

    N, Cin, D, H, W = x_ncdhw.shape
    Cout = w_oidhw.shape[0]
    HW = H * W
    M = D * HW
    K = 27 * Cin
    f32 = jnp.float32

    vmem_limit, tile_budget = _vmem_budgets()
    td = _pick_td(D, H, W, Cin, Cout, tile_budget)
    TM = td * HW
    Dp = -(-D // td) * td            # D padded up to a multiple of td
    num_m = Dp // td
    Mp = num_m * TM                  # padded flat output length
    Lp = (num_m + 1) * TM            # flat input length (one extra halo tile)
    F = W + 1                        # front zeros so tap offsets are kd*HW+kh*W+kw
    assert TM % 128 == 0 and TM >= 2 * HW + 2 * W + 2
    assert F + (D + 2) * HW <= Lp

    # Flat, lane-dense input: pad depth by 1 (Conv3d padding=1), flatten, and
    # place at offset F inside a zero buffer of Lp columns.  ~1x input traffic.
    x_dflat = jnp.pad(x_ncdhw.astype(f32),
                      ((0, 0), (0, 0), (1, 1), (0, 0), (0, 0))
                      ).reshape(N, Cin, (D + 2) * HW)
    x_flat = jnp.pad(x_dflat, ((0, 0), (0, 0), (F, Lp - F - (D + 2) * HW)))

    # Weight flattened to (Cout, 27*Cin) with (kd,kh,kw,ci) ordering to match
    # the in-kernel col assembly.
    w_col = jnp.transpose(w_oidhw.astype(f32), (0, 2, 3, 4, 1)).reshape(Cout, K)

    # Tile-invariant (h, w) coordinates per column (TM is a multiple of H*W and
    # every tile starts on a plane boundary).
    j = np.arange(TM)
    pos = jnp.asarray(np.stack([(j // W) % H, j % W]).astype(np.int32))  # (2, TM)

    # ------------- pass 1: conv (fused-K, halo'd) + per-channel stats --------
    kern1 = functools.partial(_conv_stats_kernel,
                              Cin=Cin, H=H, W=W, HW=HW, TM=TM, M=M)
    conv_out, ch_sum, ch_sq = pl.pallas_call(
        kern1,
        out_shape=(
            jax.ShapeDtypeStruct((N, Cout, Mp), f32),
            jax.ShapeDtypeStruct((N, Cout, 1), f32),
            jax.ShapeDtypeStruct((N, Cout, 1), f32),
        ),
        grid_spec=pltpu.PrefetchScalarGridSpec(
            num_scalar_prefetch=0,
            grid=(N, num_m),
            in_specs=[
                pl.BlockSpec((1, Cin, TM), lambda n, m: (n, 0, m)),      # tile m
                pl.BlockSpec((1, Cin, TM), lambda n, m: (n, 0, m + 1)),  # halo tile
                pl.BlockSpec((Cout, K), lambda n, m: (0, 0)),            # weight
                pl.BlockSpec((2, TM), lambda n, m: (0, 0)),              # (h,w) table
            ],
            out_specs=(
                pl.BlockSpec((1, Cout, TM), lambda n, m: (n, 0, m)),
                pl.BlockSpec((1, Cout, 1), lambda n, m: (n, 0, 0)),
                pl.BlockSpec((1, Cout, 1), lambda n, m: (n, 0, 0)),
            ),
            scratch_shapes=[pltpu.VMEM((K, TM), f32)],
        ),
        compiler_params=pltpu.CompilerParams(
            dimension_semantics=("parallel", "arbitrary"),
            vmem_limit_bytes=vmem_limit,
        ),
        cost_estimate=pl.CostEstimate(
            flops=2 * N * Mp * K * Cout + 4 * N * Mp * Cout,
            transcendentals=0,
            bytes_accessed=4 * (2 * N * Cin * Lp + Cout * K + 2 * TM
                                + N * Cout * Mp + 2 * N * Cout),
        ),
    )(x_flat, x_flat, w_col, pos)

    # ------- finish BN stats on tiny arrays; fold gamma/beta into scale/shift -
    count = float(N * M)
    mean = jnp.sum(ch_sum[:, :, 0], axis=0) / count                 # (Cout,)
    var = jnp.sum(ch_sq[:, :, 0], axis=0) / count - mean * mean
    var = jnp.maximum(var, 0.0)
    scale = gamma.astype(f32) * lax.rsqrt(var + EPS)
    shift = beta.astype(f32) - mean * scale
    scale2 = scale.reshape(Cout, 1)
    shift2 = shift.reshape(Cout, 1)

    # ------------- pass 2: in-place BatchNorm affine + ReLU ------------------
    out_flat = pl.pallas_call(
        _bn_relu_kernel,
        out_shape=jax.ShapeDtypeStruct((N, Cout, Mp), f32),
        grid_spec=pltpu.PrefetchScalarGridSpec(
            num_scalar_prefetch=0,
            grid=(N, num_m),
            in_specs=[
                pl.BlockSpec((1, Cout, TM), lambda n, m: (n, 0, m)),
                pl.BlockSpec((Cout, 1), lambda n, m: (0, 0)),
                pl.BlockSpec((Cout, 1), lambda n, m: (0, 0)),
            ],
            out_specs=pl.BlockSpec((1, Cout, TM), lambda n, m: (n, 0, m)),
        ),
        compiler_params=pltpu.CompilerParams(
            dimension_semantics=("parallel", "parallel"),
            vmem_limit_bytes=vmem_limit,
        ),
        input_output_aliases={0: 0},   # BN+ReLU in place over conv_out
        cost_estimate=pl.CostEstimate(
            flops=3 * N * Mp * Cout,
            transcendentals=0,
            bytes_accessed=4 * 2 * N * Cout * Mp,
        ),
    )(conv_out, scale2, shift2)

    # Flat -> NCDHW is a slice (no-op when td | D) plus a free reshape.
    return out_flat[:, :, :M].reshape(N, Cout, D, H, W)


def _reference(x, w, b, gamma, beta):
    dn = lax.conv_dimension_numbers(x.shape, w.shape, ("NCDHW", "OIDHW", "NCDHW"))
    conv = lax.conv_general_dilated(
        x, w, window_strides=(1, 1, 1), padding=[(1, 1)] * 3, dimension_numbers=dn
    ) + b.reshape(1, -1, 1, 1, 1)
    mean = conv.mean(axis=(0, 2, 3, 4), keepdims=True)
    var = ((conv - mean) ** 2).mean(axis=(0, 2, 3, 4), keepdims=True)
    y = (conv - mean) * lax.rsqrt(var + EPS)
    y = y * gamma.reshape(1, -1, 1, 1, 1) + beta.reshape(1, -1, 1, 1, 1)
    return jnp.maximum(y, 0.0)


if __name__ == "__main__":
    # Small shapes consistent with SingleConv(in_ch=4, out_ch=8) on a 3D volume.
    N, Cin, Cout, D, H, W = 2, 4, 8, 8, 8, 8

    key = jax.random.PRNGKey(0)
    kx, kwt, kbi, kg, kbt = jax.random.split(key, 5)

    x = jax.random.normal(kx, (N, Cin, D, H, W), jnp.float32)
    w = jax.random.normal(kwt, (Cout, Cin, 3, 3, 3), jnp.float32) * 0.1
    b = jax.random.normal(kbi, (Cout,), jnp.float32) * 0.1
    gamma = 1.0 + 0.1 * jax.random.normal(kg, (Cout,), jnp.float32)
    beta = 0.1 * jax.random.normal(kbt, (Cout,), jnp.float32)

    out = jax.block_until_ready(single_conv(x, w, b, gamma, beta))
    ref = jax.block_until_ready(_reference(x, w, b, gamma, beta))

    assert out.shape == (N, Cout, D, H, W)
    if not bool(jnp.allclose(out, ref, atol=1e-3, rtol=1e-3)):
        err = float(jnp.max(jnp.abs(out - ref)))
        raise AssertionError(f"Pallas SingleConv does not match reference (max err {err})")

    print("KERNEL_OK")
</pallas_src>

<mosaic_0001>
module attributes {stable_mosaic.version = 11 : i64} {
  func.func @_bn_relu_kernel(%arg0: i32, %arg1: i32, %arg2: memref<1x8x512xf32, #tpu.memory_space<vmem>>, %arg3: memref<8x1xf32, #tpu.memory_space<vmem>>, %arg4: memref<8x1xf32, #tpu.memory_space<vmem>>, %arg5: memref<1x8x512xf32, #tpu.memory_space<vmem>>) attributes {dimension_semantics = [#tpu.dimension_semantics<parallel>, #tpu.dimension_semantics<parallel>], iteration_bounds = array<i64: 2, 1>, scalar_prefetch = 0 : i64, scratch_operands = 0 : i64, tpu.core_type = #tpu.core_type<tc>, window_params = [{transform_indices = @transform_0, window_bounds = array<i64: 1, 8, 512>}, {pipeline_mode = #tpu.pipeline_mode<synchronous>, transform_indices = @transform_1, window_bounds = array<i64: 8, 1>}, {pipeline_mode = #tpu.pipeline_mode<synchronous>, transform_indices = @transform_2, window_bounds = array<i64: 8, 1>}, {transform_indices = @transform_3, window_bounds = array<i64: 1, 8, 512>}]} {
    %c0 = arith.constant 0 : index
    %c0_0 = arith.constant 0 : index
    %c0_1 = arith.constant 0 : index
    %0 = vector.load %arg2[%c0, %c0_0, %c0_1] : memref<1x8x512xf32, #tpu.memory_space<vmem>>, vector<1x8x512xf32>
    %1 = vector.shape_cast %0 : vector<1x8x512xf32> to vector<8x512xf32>
    %c0_2 = arith.constant 0 : index
    %c0_3 = arith.constant 0 : index
    %2 = vector.load %arg3[%c0_2, %c0_3] : memref<8x1xf32, #tpu.memory_space<vmem>>, vector<8x1xf32>
    %3 = vector.broadcast %2 : vector<8x1xf32> to vector<8x512xf32>
    %4 = arith.mulf %1, %3 : vector<8x512xf32>
    %c0_4 = arith.constant 0 : index
    %c0_5 = arith.constant 0 : index
    %5 = vector.load %arg4[%c0_4, %c0_5] : memref<8x1xf32, #tpu.memory_space<vmem>>, vector<8x1xf32>
    %6 = vector.broadcast %5 : vector<8x1xf32> to vector<8x512xf32>
    %7 = arith.addf %4, %6 : vector<8x512xf32>
    %cst = arith.constant 0.000000e+00 : f32
    %8 = vector.broadcast %cst : f32 to vector<8x512xf32>
    %9 = arith.maximumf %7, %8 : vector<8x512xf32>
    %c0_6 = arith.constant 0 : index
    %c0_7 = arith.constant 0 : index
    %c0_8 = arith.constant 0 : index
    %10 = vector.load %arg5[%c0_6, %c0_7, %c0_8] : memref<1x8x512xf32, #tpu.memory_space<vmem>>, vector<1x8x512xf32>
    %11 = vector.shape_cast %10 : vector<1x8x512xf32> to vector<8x512xf32>
    %12 = vector.shape_cast %9 : vector<8x512xf32> to vector<1x8x512xf32>
    tpu.vector_store %arg5[%c0_6, %c0_7, %c0_8], %12 {strides = array<i32>} : memref<1x8x512xf32, #tpu.memory_space<vmem>>, vector<1x8x512xf32>,
    return
  }
  func.func @transform_0(%arg0: i32, %arg1: i32) -> (i32, i32, i32) {
    %c0_i32 = arith.constant 0 : i32
    %c0_i32_0 = arith.constant 0 : i32
    return %arg0, %c0_i32, %arg1 : i32, i32, i32
  }
  func.func @transform_1(%arg0: i32, %arg1: i32) -> (i32, i32) {
    %c0_i32 = arith.constant 0 : i32
    %c0_i32_0 = arith.constant 0 : i32
    %c0_i32_1 = arith.constant 0 : i32
    return %c0_i32, %c0_i32_0 : i32, i32
  }
  func.func @transform_2(%arg0: i32, %arg1: i32) -> (i32, i32) {
    %c0_i32 = arith.constant 0 : i32
    %c0_i32_0 = arith.constant 0 : i32
    %c0_i32_1 = arith.constant 0 : i32
    return %c0_i32, %c0_i32_0 : i32, i32
  }
  func.func @transform_3(%arg0: i32, %arg1: i32) -> (i32, i32, i32) {
    %c0_i32 = arith.constant 0 : i32
    %c0_i32_0 = arith.constant 0 : i32
    return %arg0, %c0_i32, %arg1 : i32, i32, i32
  }
}

module attributes {stable_mosaic.version = 11 : i64} {
  func.func @_conv_stats_kernel(%arg0: i32, %arg1: i32, %arg2: memref<1x4x512xf32, #tpu.memory_space<vmem>>, %arg3: memref<1x4x512xf32, #tpu.memory_space<vmem>>, %arg4: memref<8x108xf32, #tpu.memory_space<vmem>>, %arg5: memref<2x512xi32, #tpu.memory_space<vmem>>, %arg6: memref<1x8x512xf32, #tpu.memory_space<vmem>>, %arg7: memref<1x8x1xf32, #tpu.memory_space<vmem>>, %arg8: memref<1x8x1xf32, #tpu.memory_space<vmem>>, %arg9: memref<108x512xf32, #tpu.memory_space<vmem>>) attributes {dimension_semantics = [#tpu.dimension_semantics<parallel>, #tpu.dimension_semantics<arbitrary>], iteration_bounds = array<i64: 2, 1>, scalar_prefetch = 0 : i64, scratch_operands = 1 : i64, tpu.core_type = #tpu.core_type<tc>, window_params = [{transform_indices = @transform_0, window_bounds = array<i64: 1, 4, 512>}, {transform_indices = @transform_1, window_bounds = array<i64: 1, 4, 512>}, {pipeline_mode = #tpu.pipeline_mode<synchronous>, transform_indices = @transform_2, window_bounds = array<i64: 8, 108>}, {pipeline_mode = #tpu.pipeline_mode<synchronous>, transform_indices = @transform_3, window_bounds = array<i64: 2, 512>}, {transform_indices = @transform_4, window_bounds = array<i64: 1, 8, 512>}, {transform_indices = @transform_5, window_bounds = array<i64: 1, 8, 1>}, {transform_indices = @transform_6, window_bounds = array<i64: 1, 8, 1>}]} {
    %c0_i32 = arith.constant 0 : i32
    %0 = arith.cmpi eq, %arg1, %c0_i32 : i32
    %1 = arith.extui %0 : i1 to i32
    %c0_i32_0 = arith.constant 0 : i32
    %2 = arith.cmpi ne, %1, %c0_i32_0 : i32
    scf.if %2 {
      %cst_192 = arith.constant 0.000000e+00 : f32
      %484 = vector.broadcast %cst_192 : f32 to vector<1x8x1xf32>
      %c0_193 = arith.constant 0 : index
      %c0_194 = arith.constant 0 : index
      %c0_195 = arith.constant 0 : index
      %485 = vector.load %arg7[%c0_193, %c0_194, %c0_195] : memref<1x8x1xf32, #tpu.memory_space<vmem>>, vector<1x8x1xf32>
      tpu.vector_store %arg7[%c0_193, %c0_194, %c0_195], %484 {strides = array<i32>} : memref<1x8x1xf32, #tpu.memory_space<vmem>>, vector<1x8x1xf32>,
      %cst_196 = arith.constant 0.000000e+00 : f32
      %486 = vector.broadcast %cst_196 : f32 to vector<1x8x1xf32>
      %c0_197 = arith.constant 0 : index
      %c0_198 = arith.constant 0 : index
      %c0_199 = arith.constant 0 : index
      %487 = vector.load %arg8[%c0_197, %c0_198, %c0_199] : memref<1x8x1xf32, #tpu.memory_space<vmem>>, vector<1x8x1xf32>
      tpu.vector_store %arg8[%c0_197, %c0_198, %c0_199], %486 {strides = array<i32>} : memref<1x8x1xf32, #tpu.memory_space<vmem>>, vector<1x8x1xf32>,
    } else {
    }
    %c0 = arith.constant 0 : index
    %c0_1 = arith.constant 0 : index
    %c0_2 = arith.constant 0 : index
    %3 = vector.load %arg2[%c0, %c0_1, %c0_2] : memref<1x4x512xf32, #tpu.memory_space<vmem>>, vector<1x4x512xf32>
    %4 = vector.shape_cast %3 : vector<1x4x512xf32> to vector<4x512xf32>
    %c0_3 = arith.constant 0 : index
    %c0_4 = arith.constant 0 : index
    %c0_5 = arith.constant 0 : index
    %5 = vector.load %arg3[%c0_3, %c0_4, %c0_5] : memref<1x4x512xf32, #tpu.memory_space<vmem>>, vector<1x4x512xf32>
    %6 = vector.shape_cast %5 : vector<1x4x512xf32> to vector<4x512xf32>
    %7 = tpu.concatenate %4, %6 in 1 : vector<4x512xf32>, vector<4x512xf32> -> vector<4x1024xf32>
    %c0_6 = arith.constant 0 : index
    %c0_7 = arith.constant 0 : index
    %8 = vector.load %arg5[%c0_6, %c0_7] : memref<2x512xi32, #tpu.memory_space<vmem>>, vector<1x512xi32>
    %c1 = arith.constant 1 : index
    %c0_8 = arith.constant 0 : index
    %9 = vector.load %arg5[%c1, %c0_8] : memref<2x512xi32, #tpu.memory_space<vmem>>, vector<1x512xi32>
    %c-1_i32 = arith.constant -1 : i32
    %10 = vector.broadcast %c-1_i32 : i32 to vector<1x512xi32>
    %11 = arith.addi %8, %10 : vector<1x512xi32>
    %c0_i32_9 = arith.constant 0 : i32
    %12 = vector.broadcast %c0_i32_9 : i32 to vector<1x512xi32>
    %13 = arith.cmpi sge, %11, %12 : vector<1x512xi32>
    %c8_i32 = arith.constant 8 : i32
    %14 = vector.broadcast %c8_i32 : i32 to vector<1x512xi32>
    %15 = arith.cmpi slt, %11, %14 : vector<1x512xi32>
    %16 = arith.andi %13, %15 : vector<1x512xi1>
    %c-1_i32_10 = arith.constant -1 : i32
    %17 = vector.broadcast %c-1_i32_10 : i32 to vector<1x512xi32>
    %18 = arith.addi %9, %17 : vector<1x512xi32>
    %c0_i32_11 = arith.constant 0 : i32
    %19 = vector.broadcast %c0_i32_11 : i32 to vector<1x512xi32>
    %20 = arith.cmpi sge, %18, %19 : vector<1x512xi32>
    %21 = arith.andi %16, %20 : vector<1x512xi1>
    %c8_i32_12 = arith.constant 8 : i32
    %22 = vector.broadcast %c8_i32_12 : i32 to vector<1x512xi32>
    %23 = arith.cmpi slt, %18, %22 : vector<1x512xi32>
    %24 = arith.andi %21, %23 : vector<1x512xi1>
    %25 = vector.extract_strided_slice %7 {offsets = [0, 0], sizes = [4, 512], strides = [1, 1]} : vector<4x1024xf32> to vector<4x512xf32>
    %cst = arith.constant 0.000000e+00 : f32
    %26 = vector.shape_cast %24 : vector<1x512xi1> to vector<1x512xi1>
    %27 = vector.broadcast %26 : vector<1x512xi1> to vector<4x512xi1>
    %28 = vector.broadcast %cst : f32 to vector<4x512xf32>
    %29 = arith.select %27, %25, %28 : vector<4x512xi1>, vector<4x512xf32>
    %c0_13 = arith.constant 0 : index
    %c0_14 = arith.constant 0 : index
    %30 = vector.load %arg9[%c0_13, %c0_14] : memref<108x512xf32, #tpu.memory_space<vmem>>, vector<4x512xf32>
    tpu.vector_store %arg9[%c0_13, %c0_14], %29 {strides = array<i32>} : memref<108x512xf32, #tpu.memory_space<vmem>>, vector<4x512xf32>,
    %c0_i32_15 = arith.constant 0 : i32
    %31 = vector.broadcast %c0_i32_15 : i32 to vector<1x512xi32>
    %32 = arith.addi %9, %31 : vector<1x512xi32>
    %c0_i32_16 = arith.constant 0 : i32
    %33 = vector.broadcast %c0_i32_16 : i32 to vector<1x512xi32>
    %34 = arith.cmpi sge, %32, %33 : vector<1x512xi32>
    %35 = arith.andi %16, %34 : vector<1x512xi1>
    %c8_i32_17 = arith.constant 8 : i32
    %36 = vector.broadcast %c8_i32_17 : i32 to vector<1x512xi32>
    %37 = arith.cmpi slt, %32, %36 : vector<1x512xi32>
    %38 = arith.andi %35, %37 : vector<1x512xi1>
    %39 = vector.extract_strided_slice %7 {offsets = [0, 1], sizes = [4, 512], strides = [1, 1]} : vector<4x1024xf32> to vector<4x512xf32>
    %cst_18 = arith.constant 0.000000e+00 : f32
    %40 = vector.shape_cast %38 : vector<1x512xi1> to vector<1x512xi1>
    %41 = vector.broadcast %40 : vector<1x512xi1> to vector<4x512xi1>
    %42 = vector.broadcast %cst_18 : f32 to vector<4x512xf32>
    %43 = arith.select %41, %39, %42 : vector<4x512xi1>, vector<4x512xf32>
    %c4 = arith.constant 4 : index
    %c0_19 = arith.constant 0 : index
    %44 = vector.load %arg9[%c4, %c0_19] : memref<108x512xf32, #tpu.memory_space<vmem>>, vector<4x512xf32>
    tpu.vector_store %arg9[%c4, %c0_19], %43 {strides = array<i32>} : memref<108x512xf32, #tpu.memory_space<vmem>>, vector<4x512xf32>,
    %c1_i32 = arith.constant 1 : i32
    %45 = vector.broadcast %c1_i32 : i32 to vector<1x512xi32>
    %46 = arith.addi %9, %45 : vector<1x512xi32>
    %c0_i32_20 = arith.constant 0 : i32
    %47 = vector.broadcast %c0_i32_20 : i32 to vector<1x512xi32>
    %48 = arith.cmpi sge, %46, %47 : vector<1x512xi32>
    %49 = arith.andi %16, %48 : vector<1x512xi1>
    %c8_i32_21 = arith.constant 8 : i32
    %50 = vector.broadcast %c8_i32_21 : i32 to vector<1x512xi32>
    %51 = arith.cmpi slt, %46, %50 : vector<1x512xi32>
    %52 = arith.andi %49, %51 : vector<1x512xi1>
    %53 = vector.extract_strided_slice %7 {offsets = [0, 2], sizes = [4, 512], strides = [1, 1]} : vector<4x1024xf32> to vector<4x512xf32>
    %cst_22 = arith.constant 0.000000e+00 : f32
    %54 = vector.shape_cast %52 : vector<1x512xi1> to vector<1x512xi1>
    %55 = vector.broadcast %54 : vector<1x512xi1> to vector<4x512xi1>
    %56 = vector.broadcast %cst_22 : f32 to vector<4x512xf32>
    %57 = arith.select %55, %53, %56 : vector<4x512xi1>, vector<4x512xf32>
    %c8 = arith.constant 8 : index
    %c0_23 = arith.constant 0 : index
    %58 = vector.load %arg9[%c8, %c0_23] : memref<108x512xf32, #tpu.memory_space<vmem>>, vector<4x512xf32>
    tpu.vector_store %arg9[%c8, %c0_23], %57 {strides = array<i32>} : memref<108x512xf32, #tpu.memory_space<vmem>>, vector<4x512xf32>,
    %c0_i32_24 = arith.constant 0 : i32
    %59 = vector.broadcast %c0_i32_24 : i32 to vector<1x512xi32>
    %60 = arith.addi %8, %59 : vector<1x512xi32>
    %c0_i32_25 = arith.constant 0 : i32
    %61 = vector.broadcast %c0_i32_25 : i32 to vector<1x512xi32>
    %62 = arith.cmpi sge, %60, %61 : vector<1x512xi32>
    %c8_i32_26 = arith.constant 8 : i32
    %63 = vector.broadcast %c8_i32_26 : i32 to vector<1x512xi32>
    %64 = arith.cmpi slt, %60, %63 : vector<1x512xi32>
    %65 = arith.andi %62, %64 : vector<1x512xi1>
    %c-1_i32_27 = arith.constant -1 : i32
    %66 = vector.broadcast %c-1_i32_27 : i32 to vector<1x512xi32>
    %67 = arith.addi %9, %66 : vector<1x512xi32>
    %c0_i32_28 = arith.constant 0 : i32
    %68 = vector.broadcast %c0_i32_28 : i32 to vector<1x512xi32>
    %69 = arith.cmpi sge, %67, %68 : vector<1x512xi32>
    %70 = arith.andi %65, %69 : vector<1x512xi1>
    %c8_i32_29 = arith.constant 8 : i32
    %71 = vector.broadcast %c8_i32_29 : i32 to vector<1x512xi32>
    %72 = arith.cmpi slt, %67, %71 : vector<1x512xi32>
    %73 = arith.andi %70, %72 : vector<1x512xi1>
    %74 = vector.extract_strided_slice %7 {offsets = [0, 8], sizes = [4, 512], strides = [1, 1]} : vector<4x1024xf32> to vector<4x512xf32>
    %cst_30 = arith.constant 0.000000e+00 : f32
    %75 = vector.shape_cast %73 : vector<1x512xi1> to vector<1x512xi1>
    %76 = vector.broadcast %75 : vector<1x512xi1> to vector<4x512xi1>
    %77 = vector.broadcast %cst_30 : f32 to vector<4x512xf32>
    %78 = arith.select %76, %74, %77 : vector<4x512xi1>, vector<4x512xf32>
    %c12 = arith.constant 12 : index
    %c0_31 = arith.constant 0 : index
    %79 = vector.load %arg9[%c12, %c0_31] : memref<108x512xf32, #tpu.memory_space<vmem>>, vector<4x512xf32>
    tpu.vector_store %arg9[%c12, %c0_31], %78 {strides = array<i32>} : memref<108x512xf32, #tpu.memory_space<vmem>>, vector<4x512xf32>,
    %c0_i32_32 = arith.constant 0 : i32
    %80 = vector.broadcast %c0_i32_32 : i32 to vector<1x512xi32>
    %81 = arith.addi %9, %80 : vector<1x512xi32>
    %c0_i32_33 = arith.constant 0 : i32
    %82 = vector.broadcast %c0_i32_33 : i32 to vector<1x512xi32>
    %83 = arith.cmpi sge, %81, %82 : vector<1x512xi32>
    %84 = arith.andi %65, %83 : vector<1x512xi1>
    %c8_i32_34 = arith.constant 8 : i32
    %85 = vector.broadcast %c8_i32_34 : i32 to vector<1x512xi32>
    %86 = arith.cmpi slt, %81, %85 : vector<1x512xi32>
    %87 = arith.andi %84, %86 : vector<1x512xi1>
    %88 = vector.extract_strided_slice %7 {offsets = [0, 9], sizes = [4, 512], strides = [1, 1]} : vector<4x1024xf32> to vector<4x512xf32>
    %cst_35 = arith.constant 0.000000e+00 : f32
    %89 = vector.shape_cast %87 : vector<1x512xi1> to vector<1x512xi1>
    %90 = vector.broadcast %89 : vector<1x512xi1> to vector<4x512xi1>
    %91 = vector.broadcast %cst_35 : f32 to vector<4x512xf32>
    %92 = arith.select %90, %88, %91 : vector<4x512xi1>, vector<4x512xf32>
    %c16 = arith.constant 16 : index
    %c0_36 = arith.constant 0 : index
    %93 = vector.load %arg9[%c16, %c0_36] : memref<108x512xf32, #tpu.memory_space<vmem>>, vector<4x512xf32>
    tpu.vector_store %arg9[%c16, %c0_36], %92 {strides = array<i32>} : memref<108x512xf32, #tpu.memory_space<vmem>>, vector<4x512xf32>,
    %c1_i32_37 = arith.constant 1 : i32
    %94 = vector.broadcast %c1_i32_37 : i32 to vector<1x512xi32>
    %95 = arith.addi %9, %94 : vector<1x512xi32>
    %c0_i32_38 = arith.constant 0 : i32
    %96 = vector.broadcast %c0_i32_38 : i32 to vector<1x512xi32>
    %97 = arith.cmpi sge, %95, %96 : vector<1x512xi32>
    %98 = arith.andi %65, %97 : vector<1x512xi1>
    %c8_i32_39 = arith.constant 8 : i32
    %99 = vector.broadcast %c8_i32_39 : i32 to vector<1x512xi32>
    %100 = arith.cmpi slt, %95, %99 : vector<1x512xi32>
    %101 = arith.andi %98, %100 : vector<1x512xi1>
    %102 = vector.extract_strided_slice %7 {offsets = [0, 10], sizes = [4, 512], strides = [1, 1]} : vector<4x1024xf32> to vector<4x512xf32>
    %cst_40 = arith.constant 0.000000e+00 : f32
    %103 = vector.shape_cast %101 : vector<1x512xi1> to vector<1x512xi1>
    %104 = vector.broadcast %103 : vector<1x512xi1> to vector<4x512xi1>
    %105 = vector.broadcast %cst_40 : f32 to vector<4x512xf32>
    %106 = arith.select %104, %102, %105 : vector<4x512xi1>, vector<4x512xf32>
    %c20 = arith.constant 20 : index
    %c0_41 = arith.constant 0 : index
    %107 = vector.load %arg9[%c20, %c0_41] : memref<108x512xf32, #tpu.memory_space<vmem>>, vector<4x512xf32>
    tpu.vector_store %arg9[%c20, %c0_41], %106 {strides = array<i32>} : memref<108x512xf32, #tpu.memory_space<vmem>>, vector<4x512xf32>,
    %c1_i32_42 = arith.constant 1 : i32
    %108 = vector.broadcast %c1_i32_42 : i32 to vector<1x512xi32>
    %109 = arith.addi %8, %108 : vector<1x512xi32>
    %c0_i32_43 = arith.constant 0 : i32
    %110 = vector.broadcast %c0_i32_43 : i32 to vector<1x512xi32>
    %111 = arith.cmpi sge, %109, %110 : vector<1x512xi32>
    %c8_i32_44 = arith.constant 8 : i32
    %112 = vector.broadcast %c8_i32_44 : i32 to vector<1x512xi32>
    %113 = arith.cmpi slt, %109, %112 : vector<1x512xi32>
    %114 = arith.andi %111, %113 : vector<1x512xi1>
    %c-1_i32_45 = arith.constant -1 : i32
    %115 = vector.broadcast %c-1_i32_45 : i32 to vector<1x512xi32>
    %116 = arith.addi %9, %115 : vector<1x512xi32>
    %c0_i32_46 = arith.constant 0 : i32
    %117 = vector.broadcast %c0_i32_46 : i32 to vector<1x512xi32>
    %118 = arith.cmpi sge, %116, %117 : vector<1x512xi32>
    %119 = arith.andi %114, %118 : vector<1x512xi1>
    %c8_i32_47 = arith.constant 8 : i32
    %120 = vector.broadcast %c8_i32_47 : i32 to vector<1x512xi32>
    %121 = arith.cmpi slt, %116, %120 : vector<1x512xi32>
    %122 = arith.andi %119, %121 : vector<1x512xi1>
    %123 = vector.extract_strided_slice %7 {offsets = [0, 16], sizes = [4, 512], strides = [1, 1]} : vector<4x1024xf32> to vector<4x512xf32>
    %cst_48 = arith.constant 0.000000e+00 : f32
    %124 = vector.shape_cast %122 : vector<1x512xi1> to vector<1x512xi1>
    %125 = vector.broadcast %124 : vector<1x512xi1> to vector<4x512xi1>
    %126 = vector.broadcast %cst_48 : f32 to vector<4x512xf32>
    %127 = arith.select %125, %123, %126 : vector<4x512xi1>, vector<4x512xf32>
    %c24 = arith.constant 24 : index
    %c0_49 = arith.constant 0 : index
    %128 = vector.load %arg9[%c24, %c0_49] : memref<108x512xf32, #tpu.memory_space<vmem>>, vector<4x512xf32>
    tpu.vector_store %arg9[%c24, %c0_49], %127 {strides = array<i32>} : memref<108x512xf32, #tpu.memory_space<vmem>>, vector<4x512xf32>,
    %c0_i32_50 = arith.constant 0 : i32
    %129 = vector.broadcast %c0_i32_50 : i32 to vector<1x512xi32>
    %130 = arith.addi %9, %129 : vector<1x512xi32>
    %c0_i32_51 = arith.constant 0 : i32
    %131 = vector.broadcast %c0_i32_51 : i32 to vector<1x512xi32>
    %132 = arith.cmpi sge, %130, %131 : vector<1x512xi32>
    %133 = arith.andi %114, %132 : vector<1x512xi1>
    %c8_i32_52 = arith.constant 8 : i32
    %134 = vector.broadcast %c8_i32_52 : i32 to vector<1x512xi32>
    %135 = arith.cmpi slt, %130, %134 : vector<1x512xi32>
    %136 = arith.andi %133, %135 : vector<1x512xi1>
    %137 = vector.extract_strided_slice %7 {offsets = [0, 17], sizes = [4, 512], strides = [1, 1]} : vector<4x1024xf32> to vector<4x512xf32>
    %cst_53 = arith.constant 0.000000e+00 : f32
    %138 = vector.shape_cast %136 : vector<1x512xi1> to vector<1x512xi1>
    %139 = vector.broadcast %138 : vector<1x512xi1> to vector<4x512xi1>
    %140 = vector.broadcast %cst_53 : f32 to vector<4x512xf32>
    %141 = arith.select %139, %137, %140 : vector<4x512xi1>, vector<4x512xf32>
    %c28 = arith.constant 28 : index
    %c0_54 = arith.constant 0 : index
    %142 = vector.load %arg9[%c28, %c0_54] : memref<108x512xf32, #tpu.memory_space<vmem>>, vector<4x512xf32>
    tpu.vector_store %arg9[%c28, %c0_54], %141 {strides = array<i32>} : memref<108x512xf32, #tpu.memory_space<vmem>>, vector<4x512xf32>,
    %c1_i32_55 = arith.constant 1 : i32
    %143 = vector.broadcast %c1_i32_55 : i32 to vector<1x512xi32>
    %144 = arith.addi %9, %143 : vector<1x512xi32>
    %c0_i32_56 = arith.constant 0 : i32
    %145 = vector.broadcast %c0_i32_56 : i32 to vector<1x512xi32>
    %146 = arith.cmpi sge, %144, %145 : vector<1x512xi32>
    %147 = arith.andi %114, %146 : vector<1x512xi1>
    %c8_i32_57 = arith.constant 8 : i32
    %148 = vector.broadcast %c8_i32_57 : i32 to vector<1x512xi32>
    %149 = arith.cmpi slt, %144, %148 : vector<1x512xi32>
    %150 = arith.andi %147, %149 : vector<1x512xi1>
    %151 = vector.extract_strided_slice %7 {offsets = [0, 18], sizes = [4, 512], strides = [1, 1]} : vector<4x1024xf32> to vector<4x512xf32>
    %cst_58 = arith.constant 0.000000e+00 : f32
    %152 = vector.shape_cast %150 : vector<1x512xi1> to vector<1x512xi1>
    %153 = vector.broadcast %152 : vector<1x512xi1> to vector<4x512xi1>
    %154 = vector.broadcast %cst_58 : f32 to vector<4x512xf32>
    %155 = arith.select %153, %151, %154 : vector<4x512xi1>, vector<4x512xf32>
    %c32 = arith.constant 32 : index
    %c0_59 = arith.constant 0 : index
    %156 = vector.load %arg9[%c32, %c0_59] : memref<108x512xf32, #tpu.memory_space<vmem>>, vector<4x512xf32>
    tpu.vector_store %arg9[%c32, %c0_59], %155 {strides = array<i32>} : memref<108x512xf32, #tpu.memory_space<vmem>>, vector<4x512xf32>,
    %c-1_i32_60 = arith.constant -1 : i32
    %157 = vector.broadcast %c-1_i32_60 : i32 to vector<1x512xi32>
    %158 = arith.addi %8, %157 : vector<1x512xi32>
    %c0_i32_61 = arith.constant 0 : i32
    %159 = vector.broadcast %c0_i32_61 : i32 to vector<1x512xi32>
    %160 = arith.cmpi sge, %158, %159 : vector<1x512xi32>
    %c8_i32_62 = arith.constant 8 : i32
    %161 = vector.broadcast %c8_i32_62 : i32 to vector<1x512xi32>
    %162 = arith.cmpi slt, %158, %161 : vector<1x512xi32>
    %163 = arith.andi %160, %162 : vector<1x512xi1>
    %c-1_i32_63 = arith.constant -1 : i32
    %164 = vector.broadcast %c-1_i32_63 : i32 to vector<1x512xi32>
    %165 = arith.addi %9, %164 : vector<1x512xi32>
    %c0_i32_64 = arith.constant 0 : i32
    %166 = vector.broadcast %c0_i32_64 : i32 to vector<1x512xi32>
    %167 = arith.cmpi sge, %165, %166 : vector<1x512xi32>
    %168 = arith.andi %163, %167 : vector<1x512xi1>
    %c8_i32_65 = arith.constant 8 : i32
    %169 = vector.broadcast %c8_i32_65 : i32 to vector<1x512xi32>
    %170 = arith.cmpi slt, %165, %169 : vector<1x512xi32>
    %171 = arith.andi %168, %170 : vector<1x512xi1>
    %172 = vector.extract_strided_slice %7 {offsets = [0, 64], sizes = [4, 512], strides = [1, 1]} : vector<4x1024xf32> to vector<4x512xf32>
    %cst_66 = arith.constant 0.000000e+00 : f32
    %173 = vector.shape_cast %171 : vector<1x512xi1> to vector<1x512xi1>
    %174 = vector.broadcast %173 : vector<1x512xi1> to vector<4x512xi1>
    %175 = vector.broadcast %cst_66 : f32 to vector<4x512xf32>
    %176 = arith.select %174, %172, %175 : vector<4x512xi1>, vector<4x512xf32>
    %c36 = arith.constant 36 : index
    %c0_67 = arith.constant 0 : index
    %177 = vector.load %arg9[%c36, %c0_67] : memref<108x512xf32, #tpu.memory_space<vmem>>, vector<4x512xf32>
    tpu.vector_store %arg9[%c36, %c0_67], %176 {strides = array<i32>} : memref<108x512xf32, #tpu.memory_space<vmem>>, vector<4x512xf32>,
    %c0_i32_68 = arith.constant 0 : i32
    %178 = vector.broadcast %c0_i32_68 : i32 to vector<1x512xi32>
    %179 = arith.addi %9, %178 : vector<1x512xi32>
    %c0_i32_69 = arith.constant 0 : i32
    %180 = vector.broadcast %c0_i32_69 : i32 to vector<1x512xi32>
    %181 = arith.cmpi sge, %179, %180 : vector<1x512xi32>
    %182 = arith.andi %163, %181 : vector<1x512xi1>
    %c8_i32_70 = arith.constant 8 : i32
    %183 = vector.broadcast %c8_i32_70 : i32 to vector<1x512xi32>
    %184 = arith.cmpi slt, %179, %183 : vector<1x512xi32>
    %185 = arith.andi %182, %184 : vector<1x512xi1>
    %186 = vector.extract_strided_slice %7 {offsets = [0, 65], sizes = [4, 512], strides = [1, 1]} : vector<4x1024xf32> to vector<4x512xf32>
    %cst_71 = arith.constant 0.000000e+00 : f32
    %187 = vector.shape_cast %185 : vector<1x512xi1> to vector<1x512xi1>
    %188 = vector.broadcast %187 : vector<1x512xi1> to vector<4x512xi1>
    %189 = vector.broadcast %cst_71 : f32 to vector<4x512xf32>
    %190 = arith.select %188, %186, %189 : vector<4x512xi1>, vector<4x512xf32>
    %c40 = arith.constant 40 : index
    %c0_72 = arith.constant 0 : index
    %191 = vector.load %arg9[%c40, %c0_72] : memref<108x512xf32, #tpu.memory_space<vmem>>, vector<4x512xf32>
    tpu.vector_store %arg9[%c40, %c0_72], %190 {strides = array<i32>} : memref<108x512xf32, #tpu.memory_space<vmem>>, vector<4x512xf32>,
    %c1_i32_73 = arith.constant 1 : i32
    %192 = vector.broadcast %c1_i32_73 : i32 to vector<1x512xi32>
    %193 = arith.addi %9, %192 : vector<1x512xi32>
    %c0_i32_74 = arith.constant 0 : i32
    %194 = vector.broadcast %c0_i32_74 : i32 to vector<1x512xi32>
    %195 = arith.cmpi sge, %193, %194 : vector<1x512xi32>
    %196 = arith.andi %163, %195 : vector<1x512xi1>
    %c8_i32_75 = arith.constant 8 : i32
    %197 = vector.broadcast %c8_i32_75 : i32 to vector<1x512xi32>
    %198 = arith.cmpi slt, %193, %197 : vector<1x512xi32>
    %199 = arith.andi %196, %198 : vector<1x512xi1>
    %200 = vector.extract_strided_slice %7 {offsets = [0, 66], sizes = [4, 512], strides = [1, 1]} : vector<4x1024xf32> to vector<4x512xf32>
    %cst_76 = arith.constant 0.000000e+00 : f32
    %201 = vector.shape_cast %199 : vector<1x512xi1> to vector<1x512xi1>
    %202 = vector.broadcast %201 : vector<1x512xi1> to vector<4x512xi1>
    %203 = vector.broadcast %cst_76 : f32 to vector<4x512xf32>
    %204 = arith.select %202, %200, %203 : vector<4x512xi1>, vector<4x512xf32>
    %c44 = arith.constant 44 : index
    %c0_77 = arith.constant 0 : index
    %205 = vector.load %arg9[%c44, %c0_77] : memref<108x512xf32, #tpu.memory_space<vmem>>, vector<4x512xf32>
    tpu.vector_store %arg9[%c44, %c0_77], %204 {strides = array<i32>} : memref<108x512xf32, #tpu.memory_space<vmem>>, vector<4x512xf32>,
    %c0_i32_78 = arith.constant 0 : i32
    %206 = vector.broadcast %c0_i32_78 : i32 to vector<1x512xi32>
    %207 = arith.addi %8, %206 : vector<1x512xi32>
    %c0_i32_79 = arith.constant 0 : i32
    %208 = vector.broadcast %c0_i32_79 : i32 to vector<1x512xi32>
    %209 = arith.cmpi sge, %207, %208 : vector<1x512xi32>
    %c8_i32_80 = arith.constant 8 : i32
    %210 = vector.broadcast %c8_i32_80 : i32 to vector<1x512xi32>
    %211 = arith.cmpi slt, %207, %210 : vector<1x512xi32>
    %212 = arith.andi %209, %211 : vector<1x512xi1>
    %c-1_i32_81 = arith.constant -1 : i32
    %213 = vector.broadcast %c-1_i32_81 : i32 to vector<1x512xi32>
    %214 = arith.addi %9, %213 : vector<1x512xi32>
    %c0_i32_82 = arith.constant 0 : i32
    %215 = vector.broadcast %c0_i32_82 : i32 to vector<1x512xi32>
    %216 = arith.cmpi sge, %214, %215 : vector<1x512xi32>
    %217 = arith.andi %212, %216 : vector<1x512xi1>
    %c8_i32_83 = arith.constant 8 : i32
    %218 = vector.broadcast %c8_i32_83 : i32 to vector<1x512xi32>
    %219 = arith.cmpi slt, %214, %218 : vector<1x512xi32>
    %220 = arith.andi %217, %219 : vector<1x512xi1>
    %221 = vector.extract_strided_slice %7 {offsets = [0, 72], sizes = [4, 512], strides = [1, 1]} : vector<4x1024xf32> to vector<4x512xf32>
    %cst_84 = arith.constant 0.000000e+00 : f32
    %222 = vector.shape_cast %220 : vector<1x512xi1> to vector<1x512xi1>
    %223 = vector.broadcast %222 : vector<1x512xi1> to vector<4x512xi1>
    %224 = vector.broadcast %cst_84 : f32 to vector<4x512xf32>
    %225 = arith.select %223, %221, %224 : vector<4x512xi1>, vector<4x512xf32>
    %c48 = arith.constant 48 : index
    %c0_85 = arith.constant 0 : index
    %226 = vector.load %arg9[%c48, %c0_85] : memref<108x512xf32, #tpu.memory_space<vmem>>, vector<4x512xf32>
    tpu.vector_store %arg9[%c48, %c0_85], %225 {strides = array<i32>} : memref<108x512xf32, #tpu.memory_space<vmem>>, vector<4x512xf32>,
    %c0_i32_86 = arith.constant 0 : i32
    %227 = vector.broadcast %c0_i32_86 : i32 to vector<1x512xi32>
    %228 = arith.addi %9, %227 : vector<1x512xi32>
    %c0_i32_87 = arith.constant 0 : i32
    %229 = vector.broadcast %c0_i32_87 : i32 to vector<1x512xi32>
    %230 = arith.cmpi sge, %228, %229 : vector<1x512xi32>
    %231 = arith.andi %212, %230 : vector<1x512xi1>
    %c8_i32_88 = arith.constant 8 : i32
    %232 = vector.broadcast %c8_i32_88 : i32 to vector<1x512xi32>
    %233 = arith.cmpi slt, %228, %232 : vector<1x512xi32>
    %234 = arith.andi %231, %233 : vector<1x512xi1>
    %235 = vector.extract_strided_slice %7 {offsets = [0, 73], sizes = [4, 512], strides = [1, 1]} : vector<4x1024xf32> to vector<4x512xf32>
    %cst_89 = arith.constant 0.000000e+00 : f32
    %236 = vector.shape_cast %234 : vector<1x512xi1> to vector<1x512xi1>
    %237 = vector.broadcast %236 : vector<1x512xi1> to vector<4x512xi1>
    %238 = vector.broadcast %cst_89 : f32 to vector<4x512xf32>
    %239 = arith.select %237, %235, %238 : vector<4x512xi1>, vector<4x512xf32>
    %c52 = arith.constant 52 : index
    %c0_90 = arith.constant 0 : index
    %240 = vector.load %arg9[%c52, %c0_90] : memref<108x512xf32, #tpu.memory_space<vmem>>, vector<4x512xf32>
    tpu.vector_store %arg9[%c52, %c0_90], %239 {strides = array<i32>} : memref<108x512xf32, #tpu.memory_space<vmem>>, vector<4x512xf32>,
    %c1_i32_91 = arith.constant 1 : i32
    %241 = vector.broadcast %c1_i32_91 : i32 to vector<1x512xi32>
    %242 = arith.addi %9, %241 : vector<1x512xi32>
    %c0_i32_92 = arith.constant 0 : i32
    %243 = vector.broadcast %c0_i32_92 : i32 to vector<1x512xi32>
    %244 = arith.cmpi sge, %242, %243 : vector<1x512xi32>
    %245 = arith.andi %212, %244 : vector<1x512xi1>
    %c8_i32_93 = arith.constant 8 : i32
    %246 = vector.broadcast %c8_i32_93 : i32 to vector<1x512xi32>
    %247 = arith.cmpi slt, %242, %246 : vector<1x512xi32>
    %248 = arith.andi %245, %247 : vector<1x512xi1>
    %249 = vector.extract_strided_slice %7 {offsets = [0, 74], sizes = [4, 512], strides = [1, 1]} : vector<4x1024xf32> to vector<4x512xf32>
    %cst_94 = arith.constant 0.000000e+00 : f32
    %250 = vector.shape_cast %248 : vector<1x512xi1> to vector<1x512xi1>
    %251 = vector.broadcast %250 : vector<1x512xi1> to vector<4x512xi1>
    %252 = vector.broadcast %cst_94 : f32 to vector<4x512xf32>
    %253 = arith.select %251, %249, %252 : vector<4x512xi1>, vector<4x512xf32>
    %c56 = arith.constant 56 : index
    %c0_95 = arith.constant 0 : index
    %254 = vector.load %arg9[%c56, %c0_95] : memref<108x512xf32, #tpu.memory_space<vmem>>, vector<4x512xf32>
    tpu.vector_store %arg9[%c56, %c0_95], %253 {strides = array<i32>} : memref<108x512xf32, #tpu.memory_space<vmem>>, vector<4x512xf32>,
    %c1_i32_96 = arith.constant 1 : i32
    %255 = vector.broadcast %c1_i32_96 : i32 to vector<1x512xi32>
    %256 = arith.addi %8, %255 : vector<1x512xi32>
    %c0_i32_97 = arith.constant 0 : i32
    %257 = vector.broadcast %c0_i32_97 : i32 to vector<1x512xi32>
    %258 = arith.cmpi sge, %256, %257 : vector<1x512xi32>
    %c8_i32_98 = arith.constant 8 : i32
    %259 = vector.broadcast %c8_i32_98 : i32 to vector<1x512xi32>
    %260 = arith.cmpi slt, %256, %259 : vector<1x512xi32>
    %261 = arith.andi %258, %260 : vector<1x512xi1>
    %c-1_i32_99 = arith.constant -1 : i32
    %262 = vector.broadcast %c-1_i32_99 : i32 to vector<1x512xi32>
    %263 = arith.addi %9, %262 : vector<1x512xi32>
    %c0_i32_100 = arith.constant 0 : i32
    %264 = vector.broadcast %c0_i32_100 : i32 to vector<1x512xi32>
    %265 = arith.cmpi sge, %263, %264 : vector<1x512xi32>
    %266 = arith.andi %261, %265 : vector<1x512xi1>
    %c8_i32_101 = arith.constant 8 : i32
    %267 = vector.broadcast %c8_i32_101 : i32 to vector<1x512xi32>
    %268 = arith.cmpi slt, %263, %267 : vector<1x512xi32>
    %269 = arith.andi %266, %268 : vector<1x512xi1>
    %270 = vector.extract_strided_slice %7 {offsets = [0, 80], sizes = [4, 512], strides = [1, 1]} : vector<4x1024xf32> to vector<4x512xf32>
    %cst_102 = arith.constant 0.000000e+00 : f32
    %271 = vector.shape_cast %269 : vector<1x512xi1> to vector<1x512xi1>
    %272 = vector.broadcast %271 : vector<1x512xi1> to vector<4x512xi1>
    %273 = vector.broadcast %cst_102 : f32 to vector<4x512xf32>
    %274 = arith.select %272, %270, %273 : vector<4x512xi1>, vector<4x512xf32>
    %c60 = arith.constant 60 : index
    %c0_103 = arith.constant 0 : index
    %275 = vector.load %arg9[%c60, %c0_103] : memref<108x512xf32, #tpu.memory_space<vmem>>, vector<4x512xf32>
    tpu.vector_store %arg9[%c60, %c0_103], %274 {strides = array<i32>} : memref<108x512xf32, #tpu.memory_space<vmem>>, vector<4x512xf32>,
    %c0_i32_104 = arith.constant 0 : i32
    %276 = vector.broadcast %c0_i32_104 : i32 to vector<1x512xi32>
    %277 = arith.addi %9, %276 : vector<1x512xi32>
    %c0_i32_105 = arith.constant 0 : i32
    %278 = vector.broadcast %c0_i32_105 : i32 to vector<1x512xi32>
    %279 = arith.cmpi sge, %277, %278 : vector<1x512xi32>
    %280 = arith.andi %261, %279 : vector<1x512xi1>
    %c8_i32_106 = arith.constant 8 : i32
    %281 = vector.broadcast %c8_i32_106 : i32 to vector<1x512xi32>
    %282 = arith.cmpi slt, %277, %281 : vector<1x512xi32>
    %283 = arith.andi %280, %282 : vector<1x512xi1>
    %284 = vector.extract_strided_slice %7 {offsets = [0, 81], sizes = [4, 512], strides = [1, 1]} : vector<4x1024xf32> to vector<4x512xf32>
    %cst_107 = arith.constant 0.000000e+00 : f32
    %285 = vector.shape_cast %283 : vector<1x512xi1> to vector<1x512xi1>
    %286 = vector.broadcast %285 : vector<1x512xi1> to vector<4x512xi1>
    %287 = vector.broadcast %cst_107 : f32 to vector<4x512xf32>
    %288 = arith.select %286, %284, %287 : vector<4x512xi1>, vector<4x512xf32>
    %c64 = arith.constant 64 : index
    %c0_108 = arith.constant 0 : index
    %289 = vector.load %arg9[%c64, %c0_108] : memref<108x512xf32, #tpu.memory_space<vmem>>, vector<4x512xf32>
    tpu.vector_store %arg9[%c64, %c0_108], %288 {strides = array<i32>} : memref<108x512xf32, #tpu.memory_space<vmem>>, vector<4x512xf32>,
    %c1_i32_109 = arith.constant 1 : i32
    %290 = vector.broadcast %c1_i32_109 : i32 to vector<1x512xi32>
    %291 = arith.addi %9, %290 : vector<1x512xi32>
    %c0_i32_110 = arith.constant 0 : i32
    %292 = vector.broadcast %c0_i32_110 : i32 to vector<1x512xi32>
    %293 = arith.cmpi sge, %291, %292 : vector<1x512xi32>
    %294 = arith.andi %261, %293 : vector<1x512xi1>
    %c8_i32_111 = arith.constant 8 : i32
    %295 = vector.broadcast %c8_i32_111 : i32 to vector<1x512xi32>
    %296 = arith.cmpi slt, %291, %295 : vector<1x512xi32>
    %297 = arith.andi %294, %296 : vector<1x512xi1>
    %298 = vector.extract_strided_slice %7 {offsets = [0, 82], sizes = [4, 512], strides = [1, 1]} : vector<4x1024xf32> to vector<4x512xf32>
    %cst_112 = arith.constant 0.000000e+00 : f32
    %299 = vector.shape_cast %297 : vector<1x512xi1> to vector<1x512xi1>
    %300 = vector.broadcast %299 : vector<1x512xi1> to vector<4x512xi1>
    %301 = vector.broadcast %cst_112 : f32 to vector<4x512xf32>
    %302 = arith.select %300, %298, %301 : vector<4x512xi1>, vector<4x512xf32>
    %c68 = arith.constant 68 : index
    %c0_113 = arith.constant 0 : index
    %303 = vector.load %arg9[%c68, %c0_113] : memref<108x512xf32, #tpu.memory_space<vmem>>, vector<4x512xf32>
    tpu.vector_store %arg9[%c68, %c0_113], %302 {strides = array<i32>} : memref<108x512xf32, #tpu.memory_space<vmem>>, vector<4x512xf32>,
    %c-1_i32_114 = arith.constant -1 : i32
    %304 = vector.broadcast %c-1_i32_114 : i32 to vector<1x512xi32>
    %305 = arith.addi %8, %304 : vector<1x512xi32>
    %c0_i32_115 = arith.constant 0 : i32
    %306 = vector.broadcast %c0_i32_115 : i32 to vector<1x512xi32>
    %307 = arith.cmpi sge, %305, %306 : vector<1x512xi32>
    %c8_i32_116 = arith.constant 8 : i32
    %308 = vector.broadcast %c8_i32_116 : i32 to vector<1x512xi32>
    %309 = arith.cmpi slt, %305, %308 : vector<1x512xi32>
    %310 = arith.andi %307, %309 : vector<1x512xi1>
    %c-1_i32_117 = arith.constant -1 : i32
    %311 = vector.broadcast %c-1_i32_117 : i32 to vector<1x512xi32>
    %312 = arith.addi %9, %311 : vector<1x512xi32>
    %c0_i32_118 = arith.constant 0 : i32
    %313 = vector.broadcast %c0_i32_118 : i32 to vector<1x512xi32>
    %314 = arith.cmpi sge, %312, %313 : vector<1x512xi32>
    %315 = arith.andi %310, %314 : vector<1x512xi1>
    %c8_i32_119 = arith.constant 8 : i32
    %316 = vector.broadcast %c8_i32_119 : i32 to vector<1x512xi32>
    %317 = arith.cmpi slt, %312, %316 : vector<1x512xi32>
    %318 = arith.andi %315, %317 : vector<1x512xi1>
    %319 = vector.extract_strided_slice %7 {offsets = [0, 128], sizes = [4, 512], strides = [1, 1]} : vector<4x1024xf32> to vector<4x512xf32>
    %cst_120 = arith.constant 0.000000e+00 : f32
    %320 = vector.shape_cast %318 : vector<1x512xi1> to vector<1x512xi1>
    %321 = vector.broadcast %320 : vector<1x512xi1> to vector<4x512xi1>
    %322 = vector.broadcast %cst_120 : f32 to vector<4x512xf32>
    %323 = arith.select %321, %319, %322 : vector<4x512xi1>, vector<4x512xf32>
    %c72 = arith.constant 72 : index
    %c0_121 = arith.constant 0 : index
    %324 = vector.load %arg9[%c72, %c0_121] : memref<108x512xf32, #tpu.memory_space<vmem>>, vector<4x512xf32>
    tpu.vector_store %arg9[%c72, %c0_121], %323 {strides = array<i32>} : memref<108x512xf32, #tpu.memory_space<vmem>>, vector<4x512xf32>,
    %c0_i32_122 = arith.constant 0 : i32
    %325 = vector.broadcast %c0_i32_122 : i32 to vector<1x512xi32>
    %326 = arith.addi %9, %325 : vector<1x512xi32>
    %c0_i32_123 = arith.constant 0 : i32
    %327 = vector.broadcast %c0_i32_123 : i32 to vector<1x512xi32>
    %328 = arith.cmpi sge, %326, %327 : vector<1x512xi32>
    %329 = arith.andi %310, %328 : vector<1x512xi1>
    %c8_i32_124 = arith.constant 8 : i32
    %330 = vector.broadcast %c8_i32_124 : i32 to vector<1x512xi32>
    %331 = arith.cmpi slt, %326, %330 : vector<1x512xi32>
    %332 = arith.andi %329, %331 : vector<1x512xi1>
    %333 = vector.extract_strided_slice %7 {offsets = [0, 129], sizes = [4, 512], strides = [1, 1]} : vector<4x1024xf32> to vector<4x512xf32>
    %cst_125 = arith.constant 0.000000e+00 : f32
    %334 = vector.shape_cast %332 : vector<1x512xi1> to vector<1x512xi1>
    %335 = vector.broadcast %334 : vector<1x512xi1> to vector<4x512xi1>
    %336 = vector.broadcast %cst_125 : f32 to vector<4x512xf32>
    %337 = arith.select %335, %333, %336 : vector<4x512xi1>, vector<4x512xf32>
    %c76 = arith.constant 76 : index
    %c0_126 = arith.constant 0 : index
    %338 = vector.load %arg9[%c76, %c0_126] : memref<108x512xf32, #tpu.memory_space<vmem>>, vector<4x512xf32>
    tpu.vector_store %arg9[%c76, %c0_126], %337 {strides = array<i32>} : memref<108x512xf32, #tpu.memory_space<vmem>>, vector<4x512xf32>,
    %c1_i32_127 = arith.constant 1 : i32
    %339 = vector.broadcast %c1_i32_127 : i32 to vector<1x512xi32>
    %340 = arith.addi %9, %339 : vector<1x512xi32>
    %c0_i32_128 = arith.constant 0 : i32
    %341 = vector.broadcast %c0_i32_128 : i32 to vector<1x512xi32>
    %342 = arith.cmpi sge, %340, %341 : vector<1x512xi32>
    %343 = arith.andi %310, %342 : vector<1x512xi1>
    %c8_i32_129 = arith.constant 8 : i32
    %344 = vector.broadcast %c8_i32_129 : i32 to vector<1x512xi32>
    %345 = arith.cmpi slt, %340, %344 : vector<1x512xi32>
    %346 = arith.andi %343, %345 : vector<1x512xi1>
    %347 = vector.extract_strided_slice %7 {offsets = [0, 130], sizes = [4, 512], strides = [1, 1]} : vector<4x1024xf32> to vector<4x512xf32>
    %cst_130 = arith.constant 0.000000e+00 : f32
    %348 = vector.shape_cast %346 : vector<1x512xi1> to vector<1x512xi1>
    %349 = vector.broadcast %348 : vector<1x512xi1> to vector<4x512xi1>
    %350 = vector.broadcast %cst_130 : f32 to vector<4x512xf32>
    %351 = arith.select %349, %347, %350 : vector<4x512xi1>, vector<4x512xf32>
    %c80 = arith.constant 80 : index
    %c0_131 = arith.constant 0 : index
    %352 = vector.load %arg9[%c80, %c0_131] : memref<108x512xf32, #tpu.memory_space<vmem>>, vector<4x512xf32>
    tpu.vector_store %arg9[%c80, %c0_131], %351 {strides = array<i32>} : memref<108x512xf32, #tpu.memory_space<vmem>>, vector<4x512xf32>,
    %c0_i32_132 = arith.constant 0 : i32
    %353 = vector.broadcast %c0_i32_132 : i32 to vector<1x512xi32>
    %354 = arith.addi %8, %353 : vector<1x512xi32>
    %c0_i32_133 = arith.constant 0 : i32
    %355 = vector.broadcast %c0_i32_133 : i32 to vector<1x512xi32>
    %356 = arith.cmpi sge, %354, %355 : vector<1x512xi32>
    %c8_i32_134 = arith.constant 8 : i32
    %357 = vector.broadcast %c8_i32_134 : i32 to vector<1x512xi32>
    %358 = arith.cmpi slt, %354, %357 : vector<1x512xi32>
    %359 = arith.andi %356, %358 : vector<1x512xi1>
    %c-1_i32_135 = arith.constant -1 : i32
    %360 = vector.broadcast %c-1_i32_135 : i32 to vector<1x512xi32>
    %361 = arith.addi %9, %360 : vector<1x512xi32>
    %c0_i32_136 = arith.constant 0 : i32
    %362 = vector.broadcast %c0_i32_136 : i32 to vector<1x512xi32>
    %363 = arith.cmpi sge, %361, %362 : vector<1x512xi32>
    %364 = arith.andi %359, %363 : vector<1x512xi1>
    %c8_i32_137 = arith.constant 8 : i32
    %365 = vector.broadcast %c8_i32_137 : i32 to vector<1x512xi32>
    %366 = arith.cmpi slt, %361, %365 : vector<1x512xi32>
    %367 = arith.andi %364, %366 : vector<1x512xi1>
    %368 = vector.extract_strided_slice %7 {offsets = [0, 136], sizes = [4, 512], strides = [1, 1]} : vector<4x1024xf32> to vector<4x512xf32>
    %cst_138 = arith.constant 0.000000e+00 : f32
    %369 = vector.shape_cast %367 : vector<1x512xi1> to vector<1x512xi1>
    %370 = vector.broadcast %369 : vector<1x512xi1> to vector<4x512xi1>
    %371 = vector.broadcast %cst_138 : f32 to vector<4x512xf32>
    %372 = arith.select %370, %368, %371 : vector<4x512xi1>, vector<4x512xf32>
    %c84 = arith.constant 84 : index
    %c0_139 = arith.constant 0 : index
    %373 = vector.load %arg9[%c84, %c0_139] : memref<108x512xf32, #tpu.memory_space<vmem>>, vector<4x512xf32>
    tpu.vector_store %arg9[%c84, %c0_139], %372 {strides = array<i32>} : memref<108x512xf32, #tpu.memory_space<vmem>>, vector<4x512xf32>,
    %c0_i32_140 = arith.constant 0 : i32
    %374 = vector.broadcast %c0_i32_140 : i32 to vector<1x512xi32>
    %375 = arith.addi %9, %374 : vector<1x512xi32>
    %c0_i32_141 = arith.constant 0 : i32
    %376 = vector.broadcast %c0_i32_141 : i32 to vector<1x512xi32>
    %377 = arith.cmpi sge, %375, %376 : vector<1x512xi32>
    %378 = arith.andi %359, %377 : vector<1x512xi1>
    %c8_i32_142 = arith.constant 8 : i32
    %379 = vector.broadcast %c8_i32_142 : i32 to vector<1x512xi32>
    %380 = arith.cmpi slt, %375, %379 : vector<1x512xi32>
    %381 = arith.andi %378, %380 : vector<1x512xi1>
    %382 = vector.extract_strided_slice %7 {offsets = [0, 137], sizes = [4, 512], strides = [1, 1]} : vector<4x1024xf32> to vector<4x512xf32>
    %cst_143 = arith.constant 0.000000e+00 : f32
    %383 = vector.shape_cast %381 : vector<1x512xi1> to vector<1x512xi1>
    %384 = vector.broadcast %383 : vector<1x512xi1> to vector<4x512xi1>
    %385 = vector.broadcast %cst_143 : f32 to vector<4x512xf32>
    %386 = arith.select %384, %382, %385 : vector<4x512xi1>, vector<4x512xf32>
    %c88 = arith.constant 88 : index
    %c0_144 = arith.constant 0 : index
    %387 = vector.load %arg9[%c88, %c0_144] : memref<108x512xf32, #tpu.memory_space<vmem>>, vector<4x512xf32>
    tpu.vector_store %arg9[%c88, %c0_144], %386 {strides = array<i32>} : memref<108x512xf32, #tpu.memory_space<vmem>>, vector<4x512xf32>,
    %c1_i32_145 = arith.constant 1 : i32
    %388 = vector.broadcast %c1_i32_145 : i32 to vector<1x512xi32>
    %389 = arith.addi %9, %388 : vector<1x512xi32>
    %c0_i32_146 = arith.constant 0 : i32
    %390 = vector.broadcast %c0_i32_146 : i32 to vector<1x512xi32>
    %391 = arith.cmpi sge, %389, %390 : vector<1x512xi32>
    %392 = arith.andi %359, %391 : vector<1x512xi1>
    %c8_i32_147 = arith.constant 8 : i32
    %393 = vector.broadcast %c8_i32_147 : i32 to vector<1x512xi32>
    %394 = arith.cmpi slt, %389, %393 : vector<1x512xi32>
    %395 = arith.andi %392, %394 : vector<1x512xi1>
    %396 = vector.extract_strided_slice %7 {offsets = [0, 138], sizes = [4, 512], strides = [1, 1]} : vector<4x1024xf32> to vector<4x512xf32>
    %cst_148 = arith.constant 0.000000e+00 : f32
    %397 = vector.shape_cast %395 : vector<1x512xi1> to vector<1x512xi1>
    %398 = vector.broadcast %397 : vector<1x512xi1> to vector<4x512xi1>
    %399 = vector.broadcast %cst_148 : f32 to vector<4x512xf32>
    %400 = arith.select %398, %396, %399 : vector<4x512xi1>, vector<4x512xf32>
    %c92 = arith.constant 92 : index
    %c0_149 = arith.constant 0 : index
    %401 = vector.load %arg9[%c92, %c0_149] : memref<108x512xf32, #tpu.memory_space<vmem>>, vector<4x512xf32>
    tpu.vector_store %arg9[%c92, %c0_149], %400 {strides = array<i32>} : memref<108x512xf32, #tpu.memory_space<vmem>>, vector<4x512xf32>,
    %c1_i32_150 = arith.constant 1 : i32
    %402 = vector.broadcast %c1_i32_150 : i32 to vector<1x512xi32>
    %403 = arith.addi %8, %402 : vector<1x512xi32>
    %c0_i32_151 = arith.constant 0 : i32
    %404 = vector.broadcast %c0_i32_151 : i32 to vector<1x512xi32>
    %405 = arith.cmpi sge, %403, %404 : vector<1x512xi32>
    %c8_i32_152 = arith.constant 8 : i32
    %406 = vector.broadcast %c8_i32_152 : i32 to vector<1x512xi32>
    %407 = arith.cmpi slt, %403, %406 : vector<1x512xi32>
    %408 = arith.andi %405, %407 : vector<1x512xi1>
    %c-1_i32_153 = arith.constant -1 : i32
    %409 = vector.broadcast %c-1_i32_153 : i32 to vector<1x512xi32>
    %410 = arith.addi %9, %409 : vector<1x512xi32>
    %c0_i32_154 = arith.constant 0 : i32
    %411 = vector.broadcast %c0_i32_154 : i32 to vector<1x512xi32>
    %412 = arith.cmpi sge, %410, %411 : vector<1x512xi32>
    %413 = arith.andi %408, %412 : vector<1x512xi1>
    %c8_i32_155 = arith.constant 8 : i32
    %414 = vector.broadcast %c8_i32_155 : i32 to vector<1x512xi32>
    %415 = arith.cmpi slt, %410, %414 : vector<1x512xi32>
    %416 = arith.andi %413, %415 : vector<1x512xi1>
    %417 = vector.extract_strided_slice %7 {offsets = [0, 144], sizes = [4, 512], strides = [1, 1]} : vector<4x1024xf32> to vector<4x512xf32>
    %cst_156 = arith.constant 0.000000e+00 : f32
    %418 = vector.shape_cast %416 : vector<1x512xi1> to vector<1x512xi1>
    %419 = vector.broadcast %418 : vector<1x512xi1> to vector<4x512xi1>
    %420 = vector.broadcast %cst_156 : f32 to vector<4x512xf32>
    %421 = arith.select %419, %417, %420 : vector<4x512xi1>, vector<4x512xf32>
    %c96 = arith.constant 96 : index
    %c0_157 = arith.constant 0 : index
    %422 = vector.load %arg9[%c96, %c0_157] : memref<108x512xf32, #tpu.memory_space<vmem>>, vector<4x512xf32>
    tpu.vector_store %arg9[%c96, %c0_157], %421 {strides = array<i32>} : memref<108x512xf32, #tpu.memory_space<vmem>>, vector<4x512xf32>,
    %c0_i32_158 = arith.constant 0 : i32
    %423 = vector.broadcast %c0_i32_158 : i32 to vector<1x512xi32>
    %424 = arith.addi %9, %423 : vector<1x512xi32>
    %c0_i32_159 = arith.constant 0 : i32
    %425 = vector.broadcast %c0_i32_159 : i32 to vector<1x512xi32>
    %426 = arith.cmpi sge, %424, %425 : vector<1x512xi32>
    %427 = arith.andi %408, %426 : vector<1x512xi1>
    %c8_i32_160 = arith.constant 8 : i32
    %428 = vector.broadcast %c8_i32_160 : i32 to vector<1x512xi32>
    %429 = arith.cmpi slt, %424, %428 : vector<1x512xi32>
    %430 = arith.andi %427, %429 : vector<1x512xi1>
    %431 = vector.extract_strided_slice %7 {offsets = [0, 145], sizes = [4, 512], strides = [1, 1]} : vector<4x1024xf32> to vector<4x512xf32>
    %cst_161 = arith.constant 0.000000e+00 : f32
    %432 = vector.shape_cast %430 : vector<1x512xi1> to vector<1x512xi1>
    %433 = vector.broadcast %432 : vector<1x512xi1> to vector<4x512xi1>
    %434 = vector.broadcast %cst_161 : f32 to vector<4x512xf32>
    %435 = arith.select %433, %431, %434 : vector<4x512xi1>, vector<4x512xf32>
    %c100 = arith.constant 100 : index
    %c0_162 = arith.constant 0 : index
    %436 = vector.load %arg9[%c100, %c0_162] : memref<108x512xf32, #tpu.memory_space<vmem>>, vector<4x512xf32>
    tpu.vector_store %arg9[%c100, %c0_162], %435 {strides = array<i32>} : memref<108x512xf32, #tpu.memory_space<vmem>>, vector<4x512xf32>,
    %c1_i32_163 = arith.constant 1 : i32
    %437 = vector.broadcast %c1_i32_163 : i32 to vector<1x512xi32>
    %438 = arith.addi %9, %437 : vector<1x512xi32>
    %c0_i32_164 = arith.constant 0 : i32
    %439 = vector.broadcast %c0_i32_164 : i32 to vector<1x512xi32>
    %440 = arith.cmpi sge, %438, %439 : vector<1x512xi32>
    %441 = arith.andi %408, %440 : vector<1x512xi1>
    %c8_i32_165 = arith.constant 8 : i32
    %442 = vector.broadcast %c8_i32_165 : i32 to vector<1x512xi32>
    %443 = arith.cmpi slt, %438, %442 : vector<1x512xi32>
    %444 = arith.andi %441, %443 : vector<1x512xi1>
    %445 = vector.extract_strided_slice %7 {offsets = [0, 146], sizes = [4, 512], strides = [1, 1]} : vector<4x1024xf32> to vector<4x512xf32>
    %cst_166 = arith.constant 0.000000e+00 : f32
    %446 = vector.shape_cast %444 : vector<1x512xi1> to vector<1x512xi1>
    %447 = vector.broadcast %446 : vector<1x512xi1> to vector<4x512xi1>
    %448 = vector.broadcast %cst_166 : f32 to vector<4x512xf32>
    %449 = arith.select %447, %445, %448 : vector<4x512xi1>, vector<4x512xf32>
    %c104 = arith.constant 104 : index
    %c0_167 = arith.constant 0 : index
    %450 = vector.load %arg9[%c104, %c0_167] : memref<108x512xf32, #tpu.memory_space<vmem>>, vector<4x512xf32>
    tpu.vector_store %arg9[%c104, %c0_167], %449 {strides = array<i32>} : memref<108x512xf32, #tpu.memory_space<vmem>>, vector<4x512xf32>,
    %c0_168 = arith.constant 0 : index
    %c0_169 = arith.constant 0 : index
    %451 = vector.load %arg4[%c0_168, %c0_169] : memref<8x108xf32, #tpu.memory_space<vmem>>, vector<8x108xf32>
    %c0_170 = arith.constant 0 : index
    %c0_171 = arith.constant 0 : index
    %452 = vector.load %arg9[%c0_170, %c0_171] : memref<108x512xf32, #tpu.memory_space<vmem>>, vector<108x512xf32>
    %cst_172 = arith.constant dense<0.000000e+00> : vector<8x512xf32>
    %453 = tpu.matmul %451, %452, %cst_172 {dimension_numbers = #tpu.dot_dimension_numbers<[1], [0], [0], [1], [0, 0, 1, 1], [], []>} : vector<8x108xf32>, vector<108x512xf32>, vector<8x512xf32> -> vector<8x512xf32>
    %c512_i32 = arith.constant 512 : i32
    %454 = arith.muli %arg1, %c512_i32 : i32
    %455 = tpu.iota {dimensions = array<i32: 1>} : vector<1x512xi32>
    %456 = vector.broadcast %454 : i32 to vector<1x512xi32>
    %457 = arith.addi %456, %455 : vector<1x512xi32>
    %c512_i32_173 = arith.constant 512 : i32
    %458 = vector.broadcast %c512_i32_173 : i32 to vector<1x512xi32>
    %459 = arith.cmpi slt, %457, %458 : vector<1x512xi32>
    %cst_174 = arith.constant 0.000000e+00 : f32
    %460 = vector.shape_cast %459 : vector<1x512xi1> to vector<1x512xi1>
    %461 = vector.broadcast %460 : vector<1x512xi1> to vector<8x512xi1>
    %462 = vector.broadcast %cst_174 : f32 to vector<8x512xf32>
    %463 = arith.select %461, %453, %462 : vector<8x512xi1>, vector<8x512xf32>
    %c0_175 = arith.constant 0 : index
    %c0_176 = arith.constant 0 : index
    %c0_177 = arith.constant 0 : index
    %464 = vector.load %arg6[%c0_175, %c0_176, %c0_177] : memref<1x8x512xf32, #tpu.memory_space<vmem>>, vector<1x8x512xf32>
    %465 = vector.shape_cast %464 : vector<1x8x512xf32> to vector<8x512xf32>
    %466 = vector.shape_cast %463 : vector<8x512xf32> to vector<1x8x512xf32>
    tpu.vector_store %arg6[%c0_175, %c0_176, %c0_177], %466 {strides = array<i32>} : memref<1x8x512xf32, #tpu.memory_space<vmem>>, vector<1x8x512xf32>,
    %c0_178 = arith.constant 0 : index
    %c0_179 = arith.constant 0 : index
    %c0_180 = arith.constant 0 : index
    %467 = vector.load %arg7[%c0_178, %c0_179, %c0_180] : memref<1x8x1xf32, #tpu.memory_space<vmem>>, vector<1x8x1xf32>
    %468 = vector.shape_cast %467 : vector<1x8x1xf32> to vector<8x1xf32>
    %cst_181 = arith.constant dense<0.000000e+00> : vector<8xf32>
    %469 = vector.multi_reduction <add>, %463, %cst_181 [1] : vector<8x512xf32> to vector<8xf32>
    %470 = vector.shape_cast %469 : vector<8xf32> to vector<8x1xf32>
    %471 = arith.addf %468, %470 : vector<8x1xf32>
    %c0_182 = arith.constant 0 : index
    %c0_183 = arith.constant 0 : index
    %c0_184 = arith.constant 0 : index
    %472 = vector.load %arg7[%c0_182, %c0_183, %c0_184] : memref<1x8x1xf32, #tpu.memory_space<vmem>>, vector<1x8x1xf32>
    %473 = vector.shape_cast %472 : vector<1x8x1xf32> to vector<8x1xf32>
    %474 = vector.shape_cast %471 : vector<8x1xf32> to vector<1x8x1xf32>
    tpu.vector_store %arg7[%c0_182, %c0_183, %c0_184], %474 {strides = array<i32>} : memref<1x8x1xf32, #tpu.memory_space<vmem>>, vector<1x8x1xf32>,
    %c0_185 = arith.constant 0 : index
    %c0_186 = arith.constant 0 : index
    %c0_187 = arith.constant 0 : index
    %475 = vector.load %arg8[%c0_185, %c0_186, %c0_187] : memref<1x8x1xf32, #tpu.memory_space<vmem>>, vector<1x8x1xf32>
    %476 = vector.shape_cast %475 : vector<1x8x1xf32> to vector<8x1xf32>
    %477 = arith.mulf %463, %463 : vector<8x512xf32>
    %cst_188 = arith.constant dense<0.000000e+00> : vector<8xf32>
    %478 = vector.multi_reduction <add>, %477, %cst_188 [1] : vector<8x512xf32> to vector<8xf32>
    %479 = vector.shape_cast %478 : vector<8xf32> to vector<8x1xf32>
    %480 = arith.addf %476, %479 : vector<8x1xf32>
    %c0_189 = arith.constant 0 : index
    %c0_190 = arith.constant 0 : index
    %c0_191 = arith.constant 0 : index
    %481 = vector.load %arg8[%c0_189, %c0_190, %c0_191] : memref<1x8x1xf32, #tpu.memory_space<vmem>>, vector<1x8x1xf32>
    %482 = vector.shape_cast %481 : vector<1x8x1xf32> to vector<8x1xf32>
    %483 = vector.shape_cast %480 : vector<8x1xf32> to vector<1x8x1xf32>
    tpu.vector_store %arg8[%c0_189, %c0_190, %c0_191], %483 {strides = array<i32>} : memref<1x8x1xf32, #tpu.memory_space<vmem>>, vector<1x8x1xf32>,
    return
  }
  func.func @transform_0(%arg0: i32, %arg1: i32) -> (i32, i32, i32) {
    %c0_i32 = arith.constant 0 : i32
    %c0_i32_0 = arith.constant 0 : i32
    return %arg0, %c0_i32, %arg1 : i32, i32, i32
  }
  func.func @transform_1(%arg0: i32, %arg1: i32) -> (i32, i32, i32) {
    %c1_i32 = arith.constant 1 : i32
    %0 = arith.addi %arg1, %c1_i32 : i32
    %c0_i32 = arith.constant 0 : i32
    %c0_i32_0 = arith.constant 0 : i32
    return %arg0, %c0_i32, %0 : i32, i32, i32
  }
  func.func @transform_2(%arg0: i32, %arg1: i32) -> (i32, i32) {
    %c0_i32 = arith.constant 0 : i32
    %c0_i32_0 = arith.constant 0 : i32
    %c0_i32_1 = arith.constant 0 : i32
    return %c0_i32, %c0_i32_0 : i32, i32
  }
  func.func @transform_3(%arg0: i32, %arg1: i32) -> (i32, i32) {
    %c0_i32 = arith.constant 0 : i32
    %c0_i32_0 = arith.constant 0 : i32
    %c0_i32_1 = arith.constant 0 : i32
    return %c0_i32, %c0_i32_0 : i32, i32
  }
  func.func @transform_4(%arg0: i32, %arg1: i32) -> (i32, i32, i32) {
    %c0_i32 = arith.constant 0 : i32
    %c0_i32_0 = arith.constant 0 : i32
    return %arg0, %c0_i32, %arg1 : i32, i32, i32
  }
  func.func @transform_5(%arg0: i32, %arg1: i32) -> (i32, i32, i32) {
    %c0_i32 = arith.constant 0 : i32
    %c0_i32_0 = arith.constant 0 : i32
    %c0_i32_1 = arith.constant 0 : i32
    return %arg0, %c0_i32, %c0_i32_0 : i32, i32, i32
  }
  func.func @transform_6(%arg0: i32, %arg1: i32) -> (i32, i32, i32) {
    %c0_i32 = arith.constant 0 : i32
    %c0_i32_0 = arith.constant 0 : i32
    %c0_i32_1 = arith.constant 0 : i32
    return %arg0, %c0_i32, %c0_i32_0 : i32, i32, i32
  }
}

</mosaic_0001>

<bundles_post_ra>
// kernel: single_conv.3
= control target key start
LH: loop header
LB: loop body
LE: loop exit
PB: predicated region body
PF: predicated region fallthrough
CT: control target
= control target key end

     0   :  { %s413_s12 = smov 0   ;;  %s415_s13 = smov 0   ;;  %s452_s0 = inlined_call_operand.vmem [shape: f32[2,8,512], index: 0, kind: input, shape index: {}, may-alias: {0,3}]   ;;  %s453_s1 = inlined_call_operand.vmem [shape: f32[8,1], index: 1, kind: input, shape index: {}]   ;;  %s454_s2 = inlined_call_operand.vmem [shape: f32[8,1], index: 2, kind: input, shape index: {}]   ;;  %s455_s3 = inlined_call_operand.vmem [shape: f32[2,8,512], index: 3, kind: output, shape index: {}, may-alias: {0,3}]  }
   0x1   :  { %s417_s14 = smov 0  }
   0x2 LB: > { %s25_s15 = sadd.s32 1, %s386_s13  ;;  %p333_p0 = scmp.ge.s32.totalorder %s390_s14, 1  ;;  %s390_s14 = sphi %s417_s14, %s13_s14   ;;  %s386_s13 = sphi %s415_s13, %s457_s13   ;;  %s382_s12 = sphi %s413_s12, %s456_s12  }
   0x3   : > { %p27_p1 = scmp.ge.s32.totalorder %s25_s15, 2  ;;  %p158_p2 = scmp.lt.s32.totalorder %s390_s14, 3 }
   0x5   : > { %s459_s15 = smov (%p27_p1, %s25_s15), 0  ;;  %p159_p3 = pnand %p333_p0, %p158_p2 }
   0x6   : > { %v214_v0 = vld [vmem:[%s453_s1] sm:$0xff] (!%p159_p3)  ;;  %v392_v1 = vmov (!%p159_p3), 0   ;;  %p191_p4 = scmp.lt.s32.totalorder (!%p159_p3), %s382_s12, 1 }
   0x7   : > { %162 = sbr.rel (%p159_p3) target bundleno = 146 (0x92), region = 32  ;;  %367 = vset.pattern.permute.xlu0 (!%p159_p3), %v392_v1  ;;  %v224_v2 = vld [vmem:[%s454_s2] sm:$0xff] (!%p159_p3) }
   0x8   : > { %217 = vperm.xlu0 (!%p159_p3), %367, %v214_v0  }
   0xc   : > { %227 = vperm.xlu0 (!%p159_p3), %367, %v224_v2  }
   0xe   : > { %s461_s12 = smov (!%p191_p4, %s382_s12), 1 }
   0xf   : > { %s340_s20 = sshll.u32 %s461_s12, 5 }
  0x10   : > { %s198_s23 = scalar_lea.vmem %s452_s0, %s340_s20  ;;  %s208_s26 = scalar_lea.vmem %s455_s3, %s340_s20 }
  0x11   : > { %v210_v3 = vld [vmem:[%s198_s23] sm:$0xff]  ;;  %v211_v5 = vld [vmem:[%s198_s23 + $0x8] sm:$0xff]  ;;  %v212_v6 = vld [vmem:[%s198_s23 + $0x10] sm:$0xff] }
  0x12   : > { %v213_v7 = vld [vmem:[%s198_s23 + $0x18] sm:$0xff] }
  0x87   : > { %v218_v4 = vpop.permute.xlu0 %217 }
  0x88   : > { %v220_v8 = vmul.f32 %v218_v4, %v210_v3  ;;  %v221_v9 = vmul.f32 %v218_v4, %v211_v5  ;;  %v222_v10 = vmul.f32 %v218_v4, %v212_v6  ;;  %v223_v11 = vmul.f32 %v218_v4, %v213_v7 }
  0x8b   : > { %v228_v12 = vpop.permute.xlu0 %227 }
  0x8c   : > { %v230_v13 = vadd.f32 %v228_v12, %v220_v8  ;;  %v231_v14 = vadd.f32 %v228_v12, %v221_v9  ;;  %v232_v15 = vadd.f32 %v228_v12, %v222_v10  ;;  %v233_v16 = vadd.f32 %v228_v12, %v223_v11 }
  0x8e   : > { %v234_v17 = vmax.f32 %v230_v13, 0.0  ;;  %v235_v18 = vmax.f32 %v231_v14, 0.0  ;;  %v236_v19 = vmax.f32 %v232_v15, 0.0  ;;  %v237_v20 = vmax.f32 %v233_v16, 0.0 }
  0x90   : > { %238 = vst [vmem:[%s208_s26] sm:$0xff] %v234_v17  ;;  %239 = vst [vmem:[%s208_s26 + $0x8] sm:$0xff] %v235_v18 }
  0x91   : > { %240 = vst [vmem:[%s208_s26 + $0x10] sm:$0xff] %v236_v19  ;;  %241 = vst [vmem:[%s208_s26 + $0x18] sm:$0xff] %v237_v20 }
  0x92 PF: > { %s13_s14 = sadd.s32 1, %s390_s14   ;;  %s456_s12 = smov %s386_s13 }
  0x93   : > { %p10_p5 = scmp.ge.s32.totalorder %s13_s14, 4   ;;  %s457_s13 = smov %s459_s15 }
  0x95   :  { %12 = sbr.rel (!%p10_p5) target bundleno = 2 (0x2), region = 62 }

// kernel: single_conv.2
= control target key start
LH: loop header
LB: loop body
LE: loop exit
PB: predicated region body
PF: predicated region fallthrough
CT: control target
= control target key end

     0   :  { %s1977_s21 = smov 0   ;;  %s1979_s22 = smov 0   ;;  %s3023_s0 = inlined_call_operand.vmem [shape: f32[2,4,1024], index: 0, kind: input, shape index: {}, may-alias: {0,1}]   ;;  %s3024_s1 = inlined_call_operand.vmem [shape: f32[2,4,1024], index: 1, kind: input, shape index: {}, may-alias: {0,1}]   ;;  %s3025_s2 = inlined_call_operand.vmem [shape: f32[8,108], index: 2, kind: input, shape index: {}]   ;;  %s3026_s3 = inlined_call_operand.vmem [shape: s32[2,512], index: 3, kind: input, shape index: {}]   ;;  %s3027_s4 = inlined_call_operand.vmem [shape: f32[2,8,512], index: 4, kind: output, shape index: {0}]   ;;  %s3028_s5 = inlined_call_operand.vmem [shape: f32[2,8,1], index: 5, kind: output, shape index: {1}]   ;;  %s3029_s6 = inlined_call_operand.vmem [shape: f32[2,8,1], index: 6, kind: output, shape index: {2}]  }
   0x1   :  { %s1981_s23 = smov 0  }
   0x2 LB: > { %s29_s24 = sadd.s32 1, %s1916_s22  ;;  %p1768_p0 = scmp.ge.s32.totalorder %s1920_s23, 1  ;;  %s1920_s23 = sphi %s1981_s23, %s17_s23   ;;  %s1916_s22 = sphi %s1979_s22, %s3231_s22   ;;  %s1912_s21 = sphi %s1977_s21, %s3230_s21  }
   0x3   : > { %p31_p1 = scmp.ge.s32.totalorder %s29_s24, 2  ;;  %p259_p2 = scmp.lt.s32.totalorder %s1920_s23, 3 }
   0x5   : > { %s3233_s24 = smov (%p31_p1, %s29_s24), 0  ;;  %p260_p3 = pnand %p1768_p0, %p259_p2 }
   0x6   : > { %p316_p4 = scmp.lt.s32.totalorder (!%p260_p3), %s1912_s21, 1  ;;  %v1998_v0 = vld [vmem:[%s3026_s3] ss:$2 sm:$0xf] (!%p260_p3)  ;;  %v386_v2 = vlaneseq (!%p260_p3)  ;;  %s1922_s9 = smov (!%p260_p3), 120   ;;  %v1924_v16 = vmov (!%p260_p3), 0  }
   0x7   : > { %263 = sbr.rel (%p260_p3) target bundleno = 697 (0x2b9), region = 36  ;;  %v2003_v1 = vld [vmem:[%s3026_s3 + $0x1] ss:$2 sm:$0xf] (!%p260_p3)  ;;  %vm531_vm0 = vcmp.ge.s32.totalorder (!%p260_p3), %v1998_v0, 0  ;;  %vm532_vm1 = vcmp.lt.s32.totalorder (!%p260_p3), %v1998_v0, 8 }
   0x8   : > { %v2009_v3 = vadd.s32 (!%p260_p3), 4294967295, %v2003_v1  ;;  %vm2012_vm2 = vmand (!%p260_p3), %vm531_vm0, %vm532_vm1  ;;  %v376_v5 = vadd.s32 (!%p260_p3), 4294967295, %v1998_v0  ;;  %v387_v6 = vshrl.u32 (!%p260_p3), %v386_v2, 7  ;;  %v2031_v7 = vadd.s32 (!%p260_p3), 1, %v2003_v1  ;;  %s1923_s10 = smov (!%p260_p3), 127   ;;  %s1925_s15 = smov (!%p260_p3), 126  }
   0x9   : > { %vm414_vm10 = vcmp.ge.s32.totalorder (!%p260_p3), %v2003_v1, 0  ;;  %vm3032_vm12 = vcmp.lt.s32.totalorder (!%p260_p3), %v2003_v1, 8  ;;  %v3081_v27 = vmov (!%p260_p3), 0  ;;  %v3085_v29 = vmov (!%p260_p3), 0  ;;  %s1926_s16 = smov (!%p260_p3), 118   ;;  %s1927_s17 = smov (!%p260_p3), 111  }
   0xa   : > { %vm3031_vm3 = vcmp.ge.s32.totalorder (!%p260_p3), %v2009_v3, 0  ;;  %vm3030_vm4 = vcmp.lt.s32.totalorder (!%p260_p3), %v2009_v3, 8  ;;  %vm377_vm6 = vcmp.ge.s32.totalorder (!%p260_p3), %v376_v5, 0  ;;  %vm378_vm7 = vcmp.lt.s32.totalorder (!%p260_p3), %v376_v5, 8  ;;  %s1928_s18 = smov (!%p260_p3), 119   ;;  %s1929_s19 = smov (!%p260_p3), 112  }
   0xb   : > { %vm534_vm5 = vmand (!%p260_p3), %vm2012_vm2, %vm3031_vm3  ;;  %v2058_v12 = vsub.s32 (!%p260_p3), 0, %v387_v6  ;;  %v2060_v13 = vsub.s32 (!%p260_p3), 1, %v387_v6  ;;  %v2064_v14 = vsub.s32 (!%p260_p3), 2, %v387_v6  ;;  %vm3034_vm14 = vcmp.ge.s32.totalorder (!%p260_p3), %v2031_v7, 0  ;;  %s1930_s20 = smov (!%p260_p3), 64   ;;  %s1931_s25 = smov (!%p260_p3), 62  }
   0xc   : > { %vm2037_vm8 = vmand (!%p260_p3), %vm534_vm5, %vm3030_vm4  ;;  %v2072_v18 = vsub.s32 (!%p260_p3), 3, %v387_v6  ;;  %vm3033_vm0 = vcmp.lt.s32.totalorder (!%p260_p3), %v2031_v7, 8  ;;  %v708_v39 = vadd.s32 (!%p260_p3), 1, %v1998_v0  ;;  %s1932_s26 = smov (!%p260_p3), 110   ;;  %s1933_s27 = smov (!%p260_p3), 63   ;;  %v3105_v59 = vmov (!%p260_p3), 0 }
   0xd   : > { %vm2045_vm9 = vmand (!%p260_p3), %vm377_vm6, %vm378_vm7  ;;  %s1934_s28 = smov (!%p260_p3), 55   ;;  %s1935_s30 = smov (!%p260_p3), 48   ;;  %v2308_v48 = vsel (!%p260_p3), %vm2037_vm8, 1, %v1924_v16  ;;  %vm3038_vm8 = vcmask (!%p260_p3), 982016   ;;  %v3107_v60 = vmov (!%p260_p3), 0  ;;  %v3109_v61 = vmov (!%p260_p3), 0 }
   0xe   : > { %s3235_s21 = smov (!%p316_p4, %s1912_s21), 1  ;;  %vm382_vm11 = vmand %vm2045_vm9, %vm3031_vm3  ;;  %vm710_vm3 = vcmp.lt.s32.totalorder %v708_v39, 8  ;;  %v540_v51 = vrot.slane %v2308_v48, %v2058_v12  ;;  %v544_v52 = vrot.slane %v2308_v48, %v2060_v13  ;;  %s1936_s7 = smov 56  }
   0xf   : > { %s2018_s29 = sshll.u32 %s3235_s21, 5  ;;  %vm384_vm13 = vmand %vm382_vm11, %vm3030_vm4  ;;  %vm709_vm4 = vcmp.ge.s32.totalorder %v708_v39, 0  ;;  %s1939_s12 = smov 47  }
  0x10   : > { %s323_s8 = scalar_lea.vmem %s3023_s0, %s2018_s29  ;;  %s1788_s11 = sadd.s32 16, %s2018_s29  ;;  %v385_v17 = vsel %vm384_vm13, 1, %v1924_v16  ;;  %vm415_vm15 = vmand %vm2045_vm9, %vm414_vm10 }
  0x11   : > { %v2033_v8 = vld [vmem:[%s323_s8 + $0x8] sm:$0xff]  ;;  %v2050_v11 = vld [vmem:[%s323_s8] sm:$0xff]  ;;  %v389_v19 = vrot.slane %v385_v17, %v2058_v12  ;;  %v393_v20 = vrot.slane %v385_v17, %v2060_v13  ;;  %v397_v21 = vrot.slane %v385_v17, %v2064_v14  ;;  %vm2088_vm1 = vmand %vm415_vm15, %vm3032_vm12  ;;  %s334_s14 = scalar_lea.vmem %s3024_s1, %s1788_s11  ;;  %v401_v23 = vrot.slane %v385_v17, %v2072_v18  ;;  %s1937_s8 = smov 54  }
  0x12   : > { %561 = vrot.lane.b32.xlu1 %v2033_v8, %s1922_s9  ;;  %443 = vrot.lane.b32.xlu0 %v2033_v8, %s1923_s10  ;;  %v2069_v15 = vcombine.high %v2050_v11, %v2050_v11  ;;  %vm480_vm5 = vmand %vm2045_vm9, %vm3034_vm14  ;;  %v2102_v24 = vcombine.high %v2033_v8, %v2033_v8  ;;  %v2136_v32 = vld [vmem:[%s334_s14] sm:$0xff]  ;;  %v2313_v49 = vsel %vm2088_vm1, 1, %v1924_v16  ;;  %vm3037_vm1 = vcmask 1031168   ;;  %s1938_s11 = smov 46   ;;  %s1775_s13 = sshll.u32 %s3235_s21, 3 }
  0x13   : > { %vm2104_vm6 = vcmp.eq.s32.totalorder %v389_v19, 1  ;;  %vm2108_vm7 = vcmp.eq.s32.totalorder %v393_v20, 1  ;;  %vm2112_vm11 = vcmp.eq.s32.totalorder %v397_v21, 1  ;;  %vm2118_vm13 = vmand %vm480_vm5, %vm3033_vm0  ;;  %vm2122_vm9 = vcmp.eq.s32.totalorder %v401_v23, 1 }
  0x14   : > { %v3082_v27 = vsel %vm2112_vm11, 4294967295, %v3081_v27  ;;  %v3086_v29 = vsel %vm2122_vm9, 4294967295, %v3085_v29  ;;  %v406_v30 = vsel %vm2104_vm6, %v2050_v11, 0.0  ;;  %v408_v31 = vsel %vm2112_vm11, %v2033_v8, 0.0  ;;  %vm646_vm15 = vmand %vm2012_vm2, %vm3034_vm14 }
  0x15   : > { %v409_v33 = vsel %vm2122_vm9, %v2102_v24, 0.0  ;;  %410 = vst [vmem:[#allocation2] sm:$0xf] %v406_v30  ;;  %412 = vst [vmem:[#allocation2 + $0x10] sm:$0xf] %v408_v31  ;;  %v1178_v34 = vsel %vm2108_vm7, %v2033_v8, 0.0  ;;  %v422_v53 = vrot.slane %v2313_v49, %v2058_v12  ;;  %v426_v54 = vrot.slane %v2313_v49, %v2060_v13 }
  0x16   : > { %557 = vrot.lane.b32.xlu1 %v2050_v11, %s1922_s9  ;;  %439 = vrot.lane.b32.xlu0 %v2050_v11, %s1923_s10  ;;  %v1179_v35 = vsel %vm2112_vm11, %v2102_v24, 0.0  ;;  %413 = vst [vmem:[#allocation2 + $0x18] sm:$0xf] %v409_v33  ;;  %v1180_v36 = vsel %vm2122_vm9, %v2136_v32, 0.0  ;;  %1182 = vst [vmem:[#allocation2 + $0x128] sm:$0xf] %v1178_v34  ;;  %v434_v4 = vrot.slane %v2313_v49, %v2072_v18 }
  0x17   : > { %1183 = vst [vmem:[#allocation2 + $0x130] sm:$0xf] %v1179_v35  ;;  %v407_v37 = vsel %vm2108_vm7, %v2069_v15, 0.0  ;;  %v1177_v38 = vsel %vm2104_vm6, %v2069_v15, 0.0  ;;  %1184 = vst [vmem:[#allocation2 + $0x138] sm:$0xf] %v1180_v36 }
  0x18   : > { %411 = vst [vmem:[#allocation2 + $0x8] sm:$0xf] %v407_v37  ;;  %1181 = vst [vmem:[#allocation2 + $0x120] sm:$0xf] %v1177_v38  ;;  %vm3098_vm11 = vcmp.lt.s32.totalorder %v2009_v3, 8  ;;  %v2318_v50 = vsel %vm2118_vm13, 1, %v1924_v16  ;;  %v548_v38 = vrot.slane %v2308_v48, %v2064_v14 }
  0x19   : > { %vm2167_vm5 = vmand %vm646_vm15, %vm3033_vm0  ;;  %vm3091_vm0 = vcmp.lt.s32.totalorder %v2003_v1, 8  ;;  %v487_v57 = vrot.slane %v2318_v50, %v2058_v12  ;;  %v491_v58 = vrot.slane %v2318_v50, %v2060_v13  ;;  %vm2339_vm13 = vcmp.eq.s32.totalorder %v540_v51, 1 }
  0x1a   : > { %559 = vrot.lane.b32.xlu1 %v2069_v15, %s1922_s9  ;;  %441 = vrot.lane.b32.xlu0 %v2069_v15, %s1923_s10  ;;  %vm2171_vm12 = vmand %vm709_vm4, %vm710_vm3  ;;  %v3106_v59 = vsel %vm2339_vm13, 4294967295, %v3105_v59  ;;  %v3119_v51 = vmov 0 }
  0x1b   : > { %vm762_vm15 = vmand %vm2171_vm12, %vm414_vm10 }
  0x1c   : > { %vm2185_vm14 = vmand %vm762_vm15, %vm3091_vm0  ;;  %vm3097_vm15 = vcmp.ge.s32.totalorder %v2009_v3, 0  ;;  %v430_v3 = vrot.slane %v2313_v49, %v2064_v14  ;;  %v3117_v49 = vmov 0 }
  0x1d   : > { %vm596_vm3 = vmand %vm2012_vm2, %vm414_vm10  ;;  %vm3101_vm10 = vcmp.ge.s32.totalorder %v2031_v7, 0 }
  0x1e   : > { %508 = vrot.lane.b32.xlu1 %v2033_v8, %s1925_s15  ;;  %506 = vrot.lane.b32.xlu0 %v2069_v15, %s1925_s15  ;;  %vm3094_vm4 = vmmov %vm3091_vm0 }
  0x1f   : > { %vm2207_vm0 = vmand %vm596_vm3, %vm3094_vm4  ;;  %vm2343_vm4 = vcmp.eq.s32.totalorder %v544_v52, 1 }
  0x20   : > { %vm712_vm9 = vmand %vm2171_vm12, %vm3097_vm15  ;;  %v3108_v60 = vsel %vm2343_vm4, 4294967295, %v3107_v60  ;;  %vm2347_vm15 = vcmp.eq.s32.totalorder %v422_v53, 1 }
  0x21   : > { %vm2221_vm2 = vmand %vm712_vm9, %vm3098_vm11  ;;  %vm3102_vm9 = vcmp.lt.s32.totalorder %v2031_v7, 8  ;;  %v3110_v61 = vsel %vm2347_vm15, 4294967295, %v3109_v61 }
  0x22   : > { %447 = vrot.lane.b32.xlu1 %v2136_v32, %s1923_s10  ;;  %445 = vrot.lane.b32.xlu0 %v2102_v24, %s1923_s10  ;;  %vm824_vm11 = vmand %vm2171_vm12, %vm3101_vm10  ;;  %vm3040_vm12 = vcmask 1039360   ;;  %vm2351_vm10 = vcmp.eq.s32.totalorder %v426_v54, 1  ;;  %v552_v54 = vrot.slane %v2308_v48, %v2072_v18 }
  0x23   : > { %vm2263_vm3 = vmand %vm824_vm11, %vm3102_vm9  ;;  %vm2355_vm11 = vcmp.eq.s32.totalorder %v487_v57, 1  ;;  %vm2359_vm9 = vcmp.eq.s32.totalorder %v491_v58, 1  ;;  %v3121_v57 = vmov 0  ;;  %v2426_v58 = vsel %vm2167_vm5, 1, %v1924_v16 }
  0x24   : > { %vm3123_vm5 = vcmask 982016  }
  0x26   : > { %563 = vrot.lane.b32.xlu1 %v2102_v24, %s1922_s9  ;;  %504 = vrot.lane.b32.xlu0 %v2050_v11, %s1925_s15 }
  0x2a   : > { %671 = vrot.lane.b32.xlu1 %v2069_v15, %s1926_s16  ;;  %565 = vrot.lane.b32.xlu0 %v2136_v32, %s1922_s9 }
  0x2e   : > { %787 = vrot.lane.b32.xlu1 %v2069_v15, %s1927_s17  ;;  %673 = vrot.lane.b32.xlu0 %v2033_v8, %s1926_s16 }
  0x32   : > { %510 = vrot.lane.b32.xlu1 %v2102_v24, %s1925_s15  ;;  %789 = vrot.lane.b32.xlu0 %v2033_v8, %s1927_s17 }
  0x36   : > { %669 = vrot.lane.b32.xlu1 %v2050_v11, %s1926_s16  ;;  %512 = vrot.lane.b32.xlu0 %v2136_v32, %s1925_s15 }
  0x3a   : > { %621 = vrot.lane.b32.xlu1 %v2069_v15, %s1928_s18  ;;  %785 = vrot.lane.b32.xlu0 %v2050_v11, %s1927_s17 }
  0x3e   : > { %737 = vrot.lane.b32.xlu1 %v2069_v15, %s1929_s19  ;;  %623 = vrot.lane.b32.xlu0 %v2033_v8, %s1928_s18 }
  0x42   : > { %619 = vrot.lane.b32.xlu1 %v2050_v11, %s1928_s18  ;;  %739 = vrot.lane.b32.xlu0 %v2033_v8, %s1929_s19 }
  0x46   : > { %677 = vrot.lane.b32.xlu1 %v2136_v32, %s1926_s16  ;;  %675 = vrot.lane.b32.xlu0 %v2102_v24, %s1926_s16 }
  0x4a   : > { %791 = vrot.lane.b32.xlu1 %v2102_v24, %s1927_s17  ;;  %735 = vrot.lane.b32.xlu0 %v2050_v11, %s1929_s19 }
  0x4e   : > { %876 = vrot.lane.b32.xlu1 %v2069_v15, %s1930_s20  ;;  %793 = vrot.lane.b32.xlu0 %v2136_v32, %s1927_s17 }
  0x52   : > { %942 = vrot.lane.b32.xlu1 %v2069_v15, %s1931_s25  ;;  %878 = vrot.lane.b32.xlu0 %v2033_v8, %s1930_s20 }
  0x56   : > { %625 = vrot.lane.b32.xlu1 %v2102_v24, %s1928_s18  ;;  %944 = vrot.lane.b32.xlu0 %v2033_v8, %s1931_s25 }
  0x5a   : > { %741 = vrot.lane.b32.xlu1 %v2102_v24, %s1929_s19  ;;  %627 = vrot.lane.b32.xlu0 %v2136_v32, %s1928_s18 }
  0x5e   : > { %874 = vrot.lane.b32.xlu1 %v2050_v11, %s1930_s20  ;;  %743 = vrot.lane.b32.xlu0 %v2136_v32, %s1929_s19 }
  0x62   : > { %849 = vrot.lane.b32.xlu1 %v2069_v15, %s1932_s26  ;;  %940 = vrot.lane.b32.xlu0 %v2050_v11, %s1931_s25 }
  0x66   : > { %915 = vrot.lane.b32.xlu1 %v2069_v15, %s1933_s27  ;;  %851 = vrot.lane.b32.xlu0 %v2033_v8, %s1932_s26 }
  0x6a   : > { %847 = vrot.lane.b32.xlu1 %v2050_v11, %s1932_s26  ;;  %917 = vrot.lane.b32.xlu0 %v2033_v8, %s1933_s27 }
  0x6e   : > { %882 = vrot.lane.b32.xlu1 %v2136_v32, %s1930_s20  ;;  %880 = vrot.lane.b32.xlu0 %v2102_v24, %s1930_s20  ;;  %s354_s20 = scalar_lea.vmem %s3029_s6, %s1775_s13 }
  0x72   : > { %946 = vrot.lane.b32.xlu1 %v2102_v24, %s1931_s25  ;;  %913 = vrot.lane.b32.xlu0 %v2050_v11, %s1933_s27 }
  0x76   : > { %1008 = vrot.lane.b32.xlu1 %v2069_v15, %s1934_s28  ;;  %948 = vrot.lane.b32.xlu0 %v2136_v32, %s1931_s25 }
  0x7a   : > { %1074 = vrot.lane.b32.xlu1 %v2069_v15, %s1935_s30  ;;  %1010 = vrot.lane.b32.xlu0 %v2033_v8, %s1934_s28 }
  0x7e   : > { %853 = vrot.lane.b32.xlu1 %v2102_v24, %s1932_s26  ;;  %1076 = vrot.lane.b32.xlu0 %v2033_v8, %s1935_s30 }
  0x82   : > { %919 = vrot.lane.b32.xlu1 %v2102_v24, %s1933_s27  ;;  %855 = vrot.lane.b32.xlu0 %v2136_v32, %s1932_s26 }
  0x84   : > { %v2301_v46 = vpop.permute.xlu1 %561  ;;  %v2303_v47 = vpop.permute.xlu0 %443 }
  0x86   : > { %1006 = vrot.lane.b32.xlu1 %v2050_v11, %s1934_s28  ;;  %921 = vrot.lane.b32.xlu0 %v2136_v32, %s1933_s27 }
  0x88   : > { %v558_v55 = vpop.permute.xlu1 %557  ;;  %v440_v56 = vpop.permute.xlu0 %439 }
  0x8a   : > { %981 = vrot.lane.b32.xlu1 %v2069_v15, %s1936_s7  ;;  %1072 = vrot.lane.b32.xlu0 %v2050_v11, %s1935_s30 }
  0x8c   : > { %v560_v63 = vpop.permute.xlu1 %559  ;;  %v442_v0 = vpop.permute.xlu0 %441 }
  0x8d   : > { %v568_v5 = vsel %vm3038_vm8, %v558_v55, %v560_v63  ;;  %v569_v6 = vsel %vm3038_vm8, %v560_v63, %v2301_v46  ;;  %v450_v7 = vsel %vm3040_vm12, %v440_v56, %v442_v0  ;;  %v451_v9 = vsel %vm3040_vm12, %v442_v0, %v2303_v47 }
  0x8e   : > { %v576_v10 = vsel %vm2339_vm13, %v568_v5, 0.0  ;;  %v577_v17 = vsel %vm2343_vm4, %v569_v6, 0.0  ;;  %v1225_v19 = vsel %vm2339_vm13, %v569_v6, 0.0  ;;  %v458_v20 = vsel %vm2347_vm15, %v450_v7, 0.0  ;;  %1047 = vrot.lane.b32.xlu1 %v2069_v15, %s1937_s8  ;;  %983 = vrot.lane.b32.xlu0 %v2033_v8, %s1936_s7 }
  0x8f   : > { %v584_v21 = vrot.slane %v576_v10, 4  ;;  %v585_v22 = vrot.slane %v577_v17, 4  ;;  %v1233_v23 = vrot.slane %v1225_v19, 4  ;;  %v459_v28 = vsel %vm2351_vm10, %v451_v9, 0.0 }
  0x90   : > { %v466_v30 = vrot.slane %v458_v20, 4  ;;  %v467_v31 = vrot.slane %v459_v28, 4  ;;  %v1189_v33 = vsel %vm2347_vm15, %v451_v9, 0.0  ;;  %v2389_v34 = vpop.permute.xlu1 %508  ;;  %v507_v35 = vpop.permute.xlu0 %506  ;;  %vm2407_vm8 = vcmp.eq.s32.totalorder %v434_v4, 1 }
  0x91   : > { %592 = vst [vmem:[#allocation2 + $0x20] sm:$0xf0] %v584_v21  ;;  %593 = vst [vmem:[#allocation2 + $0x28] sm:$0xf0] %v585_v22  ;;  %v1197_v36 = vrot.slane %v1189_v33, 4  ;;  %v516_v37 = vsel %vm3037_vm1, %v507_v35, %v2389_v34  ;;  %vm2403_vm1 = vcmp.eq.s32.totalorder %v430_v3, 1  ;;  %v652_v19 = vrot.slane %v2426_v58, %v2058_v12 }
  0x92   : > { %1241 = vst [vmem:[#allocation2 + $0x140] sm:$0xf0] %v1233_v23  ;;  %474 = vst [vmem:[#allocation2] sm:$0xf0] %v466_v30  ;;  %v524_v39 = vsel %vm2359_vm9, %v516_v37, 0.0  ;;  %v1213_v41 = vsel %vm2355_vm11, %v516_v37, 0.0  ;;  %979 = vrot.lane.b32.xlu1 %v2050_v11, %s1936_s7  ;;  %1049 = vrot.lane.b32.xlu0 %v2033_v8, %s1937_s8  ;;  %v656_v28 = vrot.slane %v2426_v58, %v2060_v13 }
  0x93   : > { %475 = vst [vmem:[#allocation2 + $0x8] sm:$0xf0] %v467_v31  ;;  %1205 = vst [vmem:[#allocation2 + $0x120] sm:$0xf0] %v1197_v36  ;;  %v3118_v49 = vsel %vm2403_vm1, 4294967295, %v3117_v49  ;;  %v3120_v51 = vsel %vm2407_vm8, 4294967295, %v3119_v51 }
  0x94   : > { %528 = vst [vmem:[#allocation2 + $0x28] sm:$0xf] %v524_v39  ;;  %1217 = vst [vmem:[#allocation2 + $0x140] sm:$0xf] %v1213_v41  ;;  %v2411_v52 = vpop.permute.xlu1 %447  ;;  %v446_v53 = vpop.permute.xlu0 %445  ;;  %vm2419_vm13 = vcmp.eq.s32.totalorder %v548_v38, 1  ;;  %v3125_v17 = vmov 0  ;;  %v495_v39 = vrot.slane %v2318_v50, %v2064_v14 }
  0x95   : > { %v452_v55 = vsel %vm3040_vm12, %v2303_v47, %v446_v53  ;;  %v453_v56 = vsel %vm3040_vm12, %v446_v53, %v2411_v52  ;;  %v3122_v57 = vsel %vm2419_vm13, 4294967295, %v3121_v57  ;;  %vm3124_vm12 = vcmask 1031168  }
  0x96   : > { %v460_v63 = vsel %vm2403_vm1, %v452_v55, 0.0  ;;  %v461_v48 = vsel %vm2407_vm8, %v453_v56, 0.0  ;;  %v1190_v47 = vsel %vm2351_vm10, %v452_v55, 0.0  ;;  %v1191_v0 = vsel %vm2403_vm1, %v453_v56, 0.0  ;;  %1014 = vrot.lane.b32.xlu1 %v2136_v32, %s1934_s28  ;;  %1012 = vrot.lane.b32.xlu0 %v2102_v24, %s1934_s28 }
  0x97   : > { %v468_v40 = vrot.slane %v460_v63, 4  ;;  %v469_v3 = vrot.slane %v461_v48, 4  ;;  %v1198_v4 = vrot.slane %v1190_v47, 4  ;;  %v1199_v5 = vrot.slane %v1191_v0, 4 }
  0x98   : > { %v564_v6 = vpop.permute.xlu1 %563  ;;  %v505_v7 = vpop.permute.xlu0 %504  ;;  %vm2443_vm8 = vcmp.eq.s32.totalorder %v552_v54, 1  ;;  %v3128_v63 = vmov 0  ;;  %vm3139_vm1 = vcmask 908288   ;;  %vm3143_vm15 = vcmask 1031168  }
  0x99   : > { %476 = vst [vmem:[#allocation2 + $0x10] sm:$0xf0] %v468_v40  ;;  %477 = vst [vmem:[#allocation2 + $0x18] sm:$0xf0] %v469_v3  ;;  %v570_v9 = vsel %vm3123_vm5, %v2301_v46, %v564_v6  ;;  %v515_v10 = vsel %vm3124_vm12, %v505_v7, %v507_v35  ;;  %v3126_v17 = vsel %vm2443_vm8, 4294967295, %v3125_v17  ;;  %v2464_v35 = vsel %vm2185_vm14, 1, %v1924_v16 }
  0x9a   : > { %1206 = vst [vmem:[#allocation2 + $0x128] sm:$0xf0] %v1198_v4  ;;  %1207 = vst [vmem:[#allocation2 + $0x130] sm:$0xf0] %v1199_v5  ;;  %v578_v20 = vsel %vm2419_vm13, %v570_v9, 0.0  ;;  %v1226_v21 = vsel %vm2343_vm4, %v570_v9, 0.0  ;;  %1078 = vrot.lane.b32.xlu1 %v2102_v24, %s1935_s30  ;;  %1045 = vrot.lane.b32.xlu0 %v2050_v11, %s1937_s8  ;;  %v768_v53 = vrot.slane %v2464_v35, %v2058_v12 }
  0x9b   : > { %v523_v22 = vsel %vm2355_vm11, %v515_v10, 0.0  ;;  %v1331_v46 = vld [vmem:[#allocation2 + $0x8] sm:$0xff]  ;;  %v586_v30 = vrot.slane %v578_v20, 4  ;;  %v1234_v31 = vrot.slane %v1226_v21, 4  ;;  %vm3127_vm12 = vmmov %vm3123_vm5  ;;  %vm3047_vm5 = vcmask 965632   ;;  %v1330_v9 = vld [vmem:[#allocation2] sm:$0xff] }
  0x9c   : > { %v1335_v23 = vld [vmem:[#allocation2 + $0x28] sm:$0xff]  ;;  %527 = vst [vmem:[#allocation2 + $0x20] sm:$0xf] %v523_v22  ;;  %v672_v36 = vpop.permute.xlu1 %671  ;;  %v2466_v37 = vpop.permute.xlu0 %565  ;;  %v772_v54 = vrot.slane %v2464_v35, %v2060_v13  ;;  %vm2484_vm14 = vcmp.eq.s32.totalorder %v652_v19, 1  ;;  %v3132_v3 = vmov 0  ;;  %vm2508_vm4 = vcmp.eq.s32.totalorder %v768_v53, 1 }
  0x9d   : > { %v1791_v33 = vpack.c.bf16 %v1335_v23, %v1331_v46  ;;  %594 = vst [vmem:[#allocation2 + $0x30] sm:$0xf0] %v586_v30  ;;  %1242 = vst [vmem:[#allocation2 + $0x148] sm:$0xf0] %v1234_v31  ;;  %v571_v38 = vsel %vm3127_vm12, %v564_v6, %v2466_v37  ;;  %v3129_v63 = vsel %vm2484_vm14, 4294967295, %v3128_v63  ;;  %vm2488_vm12 = vcmp.eq.s32.totalorder %v656_v28, 1 }
  0x9e   : > { %v579_v41 = vsel %vm2443_vm8, %v571_v38, 0.0  ;;  %v1227_v42 = vsel %vm2419_vm13, %v571_v38, 0.0  ;;  %1140 = vrot.lane.b32.xlu1 %v2069_v15, %s1938_s11  ;;  %1080 = vrot.lane.b32.xlu0 %v2136_v32, %s1935_s30  ;;  %vm2496_vm8 = vcmp.eq.s32.totalorder %v495_v39, 1  ;;  %v3134_v6 = vmov 0 }
  0x9f   : > { %1792 = vmatprep.subr.bf16.mxu0 %v1791_v33  ;;  %v587_v55 = vrot.slane %v579_v41, 4  ;;  %v1235_v56 = vrot.slane %v1227_v42, 4  ;;  %v3133_v3 = vsel %vm2496_vm8, 4294967295, %v3132_v3  ;;  %v3135_v6 = vsel %vm2508_vm4, 4294967295, %v3134_v6 }
  0xa0   : > { %v788_v47 = vpop.permute.xlu1 %787  ;;  %v2492_v0 = vpop.permute.xlu0 %673  ;;  %v3136_v7 = vmov 0  ;;  %v499_v22 = vrot.slane %v2318_v50, %v2072_v18  ;;  %vm3138_vm13 = vcmask 1031168   ;;  %v3140_v41 = vmov 0 }
  0xa1   : > { %595 = vst [vmem:[#allocation2 + $0x38] sm:$0xf0] %v587_v55  ;;  %1243 = vst [vmem:[#allocation2 + $0x150] sm:$0xf0] %v1235_v56  ;;  %v681_v40 = vsel %vm3047_vm5, %v672_v36, %v2492_v0  ;;  %vm2512_vm5 = vcmp.eq.s32.totalorder %v772_v54, 1  ;;  %v2545_v54 = vsel %vm2207_vm0, 1, %v1924_v16 }
  0xa2   : > { %v689_v4 = vsel %vm2488_vm12, %v681_v40, 0.0  ;;  %v1261_v5 = vsel %vm2484_vm14, %v681_v40, 0.0  ;;  %985 = vrot.lane.b32.xlu1 %v2102_v24, %s1936_s7  ;;  %1142 = vrot.lane.b32.xlu0 %v2033_v8, %s1938_s11  ;;  %v3137_v7 = vsel %vm2512_vm5, 4294967295, %v3136_v7  ;;  %vm3144_vm0 = vcmask 908288  }
  0xa3   : > { %v1334_v10 = vld [vmem:[#allocation2 + $0x20] sm:$0xff]  ;;  %v697_v19 = vrot.slane %v689_v4, 4  ;;  %v1269_v20 = vrot.slane %v1261_v5, 4  ;;  %v614_v26 = vrot.slane %v2545_v54, %v2072_v18 }
  0xa4   : > { %v1793_v21 = vpack.c.bf16 %v1334_v10, %v1330_v9  ;;  %v511_v46 = vpop.permute.xlu1 %510  ;;  %v2518_v23 = vpop.permute.xlu0 %789  ;;  %v606_v9 = vrot.slane %v2545_v54, %v2060_v13  ;;  %v2567_v10 = vsel %vm2221_vm2, 1, %v1924_v16 }
  0xa5   : > { %705 = vst [vmem:[#allocation2 + $0x48] sm:$0xf0] %v697_v19  ;;  %1277 = vst [vmem:[#allocation2 + $0x160] sm:$0xf0] %v1269_v20  ;;  %v517_v28 = vsel %vm3138_vm13, %v2389_v34, %v511_v46  ;;  %v797_v30 = vsel %vm3139_vm1, %v788_v47, %v2518_v23  ;;  %vm2536_vm1 = vcmp.eq.s32.totalorder %v499_v22, 1  ;;  %vm3142_vm13 = vcmask 965632  }
  0xa6   : > { %1794 = vmatpush1.bf16.msra.mxu0 %v1793_v21  ;;  %v525_v31 = vsel %vm2496_vm8, %v517_v28, 0.0  ;;  %v1214_v33 = vsel %vm2359_vm9, %v517_v28, 0.0  ;;  %v805_v50 = vsel %vm2512_vm5, %v797_v30, 0.0  ;;  %v1297_v38 = vsel %vm2508_vm4, %v797_v30, 0.0  ;;  %1051 = vrot.lane.b32.xlu1 %v2102_v24, %s1937_s8 }
  0xa7   : > { %987 = vrot.lane.b32.xlu0 %v2136_v32, %s1936_s7  ;;  %529 = vst [vmem:[#allocation2 + $0x30] sm:$0xf] %v525_v31  ;;  %1218 = vst [vmem:[#allocation2 + $0x148] sm:$0xf] %v1214_v33  ;;  %v813_v34 = vrot.slane %v805_v50, 4  ;;  %v1305_v39 = vrot.slane %v1297_v38, 4  ;;  %v718_v44 = vrot.slane %v2567_v10, %v2058_v12  ;;  %v722_v30 = vrot.slane %v2567_v10, %v2060_v13 }
  0xa8   : > { %v3141_v41 = vsel %vm2536_vm1, 4294967295, %v3140_v41  ;;  %v670_v42 = vpop.permute.xlu1 %669  ;;  %v2540_v53 = vpop.permute.xlu0 %512  ;;  %v3145_v28 = vmov 0 }
  0xa9   : > { %821 = vst [vmem:[#allocation2 + $0x68] sm:$0xf0] %v813_v34  ;;  %1313 = vst [vmem:[#allocation2 + $0x180] sm:$0xf0] %v1305_v39  ;;  %v680_v55 = vsel %vm3142_vm13, %v670_v42, %v672_v36  ;;  %v518_v56 = vsel %vm3143_vm15, %v511_v46, %v2540_v53  ;;  %v602_v36 = vrot.slane %v2545_v54, %v2058_v12  ;;  %vm3052_vm15 = vcmask 973824   ;;  %v1333_v34 = vld [vmem:[#allocation2 + $0x18] sm:$0xff] }
  0xaa   : > { %v688_v40 = vsel %vm2484_vm14, %v680_v55, 0.0  ;;  %v526_v4 = vsel %vm2536_vm1, %v518_v56, 0.0  ;;  %v1215_v5 = vsel %vm2496_vm8, %v518_v56, 0.0  ;;  %1138 = vrot.lane.b32.xlu1 %v2050_v11, %s1938_s11  ;;  %vm2582_vm13 = vcmp.eq.s32.totalorder %v606_v9, 1 }
  0xab   : > { %1053 = vrot.lane.b32.xlu0 %v2136_v32, %s1937_s8  ;;  %v696_v43 = vrot.slane %v688_v40, 4  ;;  %530 = vst [vmem:[#allocation2 + $0x38] sm:$0xf] %v526_v4  ;;  %1219 = vst [vmem:[#allocation2 + $0x150] sm:$0xf] %v1215_v5  ;;  %vm2578_vm2 = vcmp.eq.s32.totalorder %v602_v36, 1  ;;  %v2608_v42 = vcombine.high %v2136_v32, %v2136_v32  ;;  %v664_v4 = vrot.slane %v2426_v58, %v2072_v18 }
  0xac   : > { %v622_v19 = vpop.permute.xlu1 %621  ;;  %v786_v20 = vpop.permute.xlu0 %785  ;;  %v3146_v28 = vsel %vm2578_vm2, 4294967295, %v3145_v28  ;;  %v1332_v36 = vld [vmem:[#allocation2 + $0x10] sm:$0xff]  ;;  %vm3153_vm14 = vcmask 916480  }
  0xad   : > { %704 = vst [vmem:[#allocation2 + $0x40] sm:$0xf0] %v696_v43  ;;  %v796_v21 = vsel %vm3144_vm0, %v786_v20, %v788_v47  ;;  %vm2610_vm0 = vcmp.eq.s32.totalorder %v722_v30, 1  ;;  %v3156_v30 = vmov 0 }
  0xae   : > { %v804_v22 = vsel %vm2508_vm4, %v796_v21, 0.0  ;;  %1115 = vrot.lane.b32.xlu1 %v2033_v8, %s1939_s12  ;;  %vm2602_vm4 = vcmp.eq.s32.totalorder %v718_v44, 1  ;;  %v1336_v55 = vld [vmem:[#allocation2 + $0x30] sm:$0xff] }
  0xaf   : > { %1113 = vrot.lane.b32.xlu0 %v2069_v15, %s1939_s12  ;;  %v812_v46 = vrot.slane %v804_v22, 4  ;;  %v1823_v21 = vpack.c.bf16 %v1336_v55, %v1332_v36  ;;  %v776_v22 = vrot.slane %v2464_v35, %v2064_v14  ;;  %v780_v55 = vrot.slane %v2464_v35, %v2072_v18 }
  0xb0   : > { %v2588_v8 = vpop.permute.xlu1 %737  ;;  %v2590_v31 = vpop.permute.xlu0 %623 }
  0xb1   : > { %820 = vst [vmem:[#allocation2 + $0x60] sm:$0xf0] %v812_v46  ;;  %v631_v15 = vsel %vm3052_vm15, %v622_v19, %v2590_v31  ;;  %vm2650_vm8 = vcmp.eq.s32.totalorder %v776_v22, 1 }
  0xb2   : > { %v639_v33 = vsel %vm2582_vm13, %v631_v15, 0.0  ;;  %v1249_v50 = vsel %vm2578_vm2, %v631_v15, 0.0  ;;  %1144 = vrot.lane.b32.xlu1 %v2102_v24, %s1938_s11  ;;  %v1337_v39 = vld [vmem:[#allocation2 + $0x38] sm:$0xff] }
  0xb3   : > { %1111 = vrot.lane.b32.xlu0 %v2050_v11, %s1939_s12  ;;  %643 = vst [vmem:[#allocation2 + $0x48] sm:$0xf] %v639_v33  ;;  %1253 = vst [vmem:[#allocation2 + $0x160] sm:$0xf] %v1249_v50  ;;  %v1821_v40 = vpack.c.bf16 %v1337_v39, %v1333_v34  ;;  %v660_v11 = vrot.slane %v2426_v58, %v2064_v14  ;;  %v3160_v39 = vmov 0 }
  0xb4   : > { %v620_v5 = vpop.permute.xlu1 %619  ;;  %v2618_v43 = vpop.permute.xlu0 %739  ;;  %v3161_v39 = vsel %vm2650_vm8, 4294967295, %v3160_v39 }
  0xb5   : > { %v630_v9 = vsel %vm3052_vm15, %v620_v5, %v622_v19  ;;  %v747_v20 = vsel %vm3153_vm14, %v2588_v8, %v2618_v43  ;;  %1822 = vmatprep.subr.bf16.mxu1 %v1821_v40  ;;  %vm2636_vm14 = vcmp.eq.s32.totalorder %v660_v11, 1  ;;  %vm2640_vm15 = vcmp.eq.s32.totalorder %v664_v4, 1 }
  0xb6   : > { %v638_v44 = vsel %vm2578_vm2, %v630_v9, 0.0  ;;  %v755_v58 = vsel %vm2610_vm0, %v747_v20, 0.0  ;;  %v1285_v46 = vsel %vm2602_vm4, %v747_v20, 0.0  ;;  %1185 = vrot.lane.b32.xlu1 %v2608_v42, %s1923_s10  ;;  %1824 = vmatpush1.bf16.msra.mxu1 %v1823_v21  ;;  %v3157_v30 = vsel %vm2640_vm15, 4294967295, %v3156_v30 }
  0xb7   : > { %1146 = vrot.lane.b32.xlu0 %v2136_v32, %s1938_s11  ;;  %642 = vst [vmem:[#allocation2 + $0x40] sm:$0xf] %v638_v44  ;;  %759 = vst [vmem:[#allocation2 + $0x68] sm:$0xf] %v755_v58  ;;  %vm3158_vm2 = vcmask 965632  }
  0xb8   : > { %1289 = vst [vmem:[#allocation2 + $0x180] sm:$0xf] %v1285_v46  ;;  %v2644_v15 = vpop.permute.xlu1 %677  ;;  %v676_v33 = vpop.permute.xlu0 %675  ;;  %vm3159_vm1 = vmmov %vm3158_vm2 }
  0xb9   : > { %v682_v50 = vsel %vm3158_vm2, %v2492_v0, %v676_v33  ;;  %v683_v34 = vsel %vm3159_vm1, %v676_v33, %v2644_v15  ;;  %vm3162_vm1 = vcmask 908288   ;;  %vm3163_vm2 = vcmask 916480  }
  0xba   : > { %v690_v40 = vsel %vm2636_vm14, %v682_v50, 0.0  ;;  %v691_v11 = vsel %vm2640_vm15, %v683_v34, 0.0  ;;  %v1262_v4 = vsel %vm2488_vm12, %v682_v50, 0.0  ;;  %v1263_v0 = vsel %vm2636_vm14, %v683_v34, 0.0  ;;  %1119 = vrot.lane.b32.xlu1 %v2136_v32, %s1939_s12  ;;  %v1339_v46 = vld [vmem:[#allocation2 + $0x48] sm:$0xff] }
  0xbb   : > { %1117 = vrot.lane.b32.xlu0 %v2102_v24, %s1939_s12  ;;  %v698_v5 = vrot.slane %v690_v40, 4  ;;  %v699_v35 = vrot.slane %v691_v11, 4  ;;  %v1270_v36 = vrot.slane %v1262_v4, 4  ;;  %v1271_v9 = vrot.slane %v1263_v0, 4 }
  0xbc   : > { %v792_v20 = vpop.permute.xlu1 %791  ;;  %v736_v21 = vpop.permute.xlu0 %735 }
  0xbd   : > { %706 = vst [vmem:[#allocation2 + $0x50] sm:$0xf0] %v698_v5  ;;  %707 = vst [vmem:[#allocation2 + $0x58] sm:$0xf0] %v699_v35  ;;  %v798_v22 = vsel %vm3162_vm1, %v2518_v23, %v792_v20  ;;  %v746_v44 = vsel %vm3163_vm2, %v736_v21, %v2588_v8  ;;  %vm2682_vm1 = vcmp.eq.s32.totalorder %v780_v55, 1  ;;  %v3164_v8 = vmov 0 }
  0xbe   : > { %1278 = vst [vmem:[#allocation2 + $0x168] sm:$0xf0] %v1270_v36  ;;  %1279 = vst [vmem:[#allocation2 + $0x170] sm:$0xf0] %v1271_v9  ;;  %v806_v32 = vsel %vm2650_vm8, %v798_v22, 0.0  ;;  %v1298_v24 = vsel %vm2512_vm5, %v798_v22, 0.0  ;;  %1257 = vrot.lane.b32.xlu1 %v2608_v42, %s1926_s16  ;;  %v610_v5 = vrot.slane %v2545_v54, %v2064_v14  ;;  %s350_s16 = scalar_lea.vmem %s3028_s5, %s1775_s13 }
  0xbf   : > { %v754_v58 = vsel %vm2602_vm4, %v746_v44, 0.0  ;;  %1221 = vrot.lane.b32.xlu0 %v2608_v42, %s1922_s9  ;;  %v1343_v23 = vld [vmem:[#allocation2 + $0x68] sm:$0xff]  ;;  %v814_v33 = vrot.slane %v806_v32, 4  ;;  %v1306_v50 = vrot.slane %v1298_v24, 4  ;;  %v3165_v8 = vsel %vm2682_vm1, 4294967295, %v3164_v8  ;;  %v1338_v24 = vld [vmem:[#allocation2 + $0x40] sm:$0xff] }
  0xc0   : > { %758 = vst [vmem:[#allocation2 + $0x60] sm:$0xf] %v754_v58  ;;  %v1795_v34 = vpack.c.bf16 %v1343_v23, %v1339_v46  ;;  %v2686_v40 = vpop.permute.xlu1 %876  ;;  %v2688_v11 = vpop.permute.xlu0 %793  ;;  %vm3166_vm2 = vcmask 908288   ;;  %vm3061_vm5 = vcmask 523264   ;;  %v1940_v9 = vmov 0.0  }
  0xc1   : > { %822 = vst [vmem:[#allocation2 + $0x70] sm:$0xf0] %v814_v33  ;;  %1314 = vst [vmem:[#allocation2 + $0x188] sm:$0xf0] %v1306_v50  ;;  %v799_v4 = vsel %vm3166_vm2, %v792_v20, %v2688_v11  ;;  %1467 = vmatprep.mubr.f32.mxu0 %v1940_v9  ;;  %1538 = vmatprep.mubr.f32.mxu1 %v1940_v9  ;;  %vm2717_vm2 = vcmp.eq.s32.totalorder %v610_v5, 1  ;;  %v726_v33 = vrot.slane %v2567_v10, %v2064_v14 }
  0xc2   : > { %1796 = vmatprep.subr.bf16.mxu0 %v1795_v34  ;;  %v807_v0 = vsel %vm2682_vm1, %v799_v4, 0.0  ;;  %v1299_v55 = vsel %vm2650_vm8, %v799_v4, 0.0  ;;  %1245 = vrot.lane.b32.xlu1 %v2608_v42, %s1928_s18  ;;  %vm3060_vm1 = vcmask 506880   ;;  %vm3179_vm8 = vcmask 916480  }
  0xc3   : > { %1209 = vrot.lane.b32.xlu0 %v2608_v42, %s1925_s15  ;;  %v815_v35 = vrot.slane %v807_v0, 4  ;;  %v1307_v36 = vrot.slane %v1299_v55, 4 }
  0xc4   : > { %v2704_v20 = vpop.permute.xlu1 %942  ;;  %v2706_v21 = vpop.permute.xlu0 %878 }
  0xc5   : > { %823 = vst [vmem:[#allocation2 + $0x78] sm:$0xf0] %v815_v35  ;;  %1315 = vst [vmem:[#allocation2 + $0x190] sm:$0xf0] %v1307_v36  ;;  %v886_v22 = vsel %vm3061_vm5, %v2686_v40, %v2706_v21  ;;  %vm3175_vm5 = vcmask 973824  }
  0xc6   : > { %v894_v44 = vsel %vm2108_vm7, %v886_v22, 0.0  ;;  %1281 = vrot.lane.b32.xlu1 %v2608_v42, %s1929_s19  ;;  %vm3169_vm7 = vcmask 973824   ;;  %v730_v22 = vrot.slane %v2567_v10, %v2072_v18  ;;  %s345_s19 = scalar_lea.vmem %s3027_s4, %s2018_s29 }
  0xc7   : > { %1293 = vrot.lane.b32.xlu0 %v2608_v42, %s1927_s17  ;;  %v1342_v58 = vld [vmem:[#allocation2 + $0x60] sm:$0xff]  ;;  %v902_v46 = vrot.slane %v894_v44, 4 }
  0xc8   : > { %v1797_v23 = vpack.c.bf16 %v1342_v58, %v1338_v24  ;;  %v626_v50 = vpop.permute.xlu1 %625  ;;  %v2725_v34 = vpop.permute.xlu0 %944 }
  0xc9   : > { %910 = vst [vmem:[#allocation2 + $0x88] sm:$0xf0] %v902_v46  ;;  %v632_v4 = vsel %vm3169_vm7, %v2590_v31, %v626_v50  ;;  %v952_v0 = vsel %vm3060_vm1, %v2704_v20, %v2725_v34  ;;  %vm2740_vm7 = vcmp.eq.s32.totalorder %v726_v33, 1  ;;  %vm2744_vm1 = vcmp.eq.s32.totalorder %v614_v26, 1 }
  0xca   : > { %1798 = vmatpush1.bf16.msra.mxu0 %v1797_v23  ;;  %v640_v55 = vsel %vm2717_vm2, %v632_v4, 0.0  ;;  %v1250_v5 = vsel %vm2582_vm13, %v632_v4, 0.0  ;;  %v960_v54 = vsel %vm2359_vm9, %v952_v0, 0.0  ;;  %vm3174_vm9 = vcmask 916480  }
  0xcb   : > { %1317 = vrot.lane.b32.xlu0 %v2608_v42, %s1932_s26  ;;  %644 = vst [vmem:[#allocation2 + $0x50] sm:$0xf] %v640_v55  ;;  %1254 = vst [vmem:[#allocation2 + $0x168] sm:$0xf] %v1250_v5  ;;  %v968_v31 = vrot.slane %v960_v54, 4 }
  0xcc   : > { %v742_v44 = vpop.permute.xlu1 %741  ;;  %v2750_v2 = vpop.permute.xlu0 %627 }
  0xcd   : > { %976 = vst [vmem:[#allocation2 + $0xa8] sm:$0xf0] %v968_v31  ;;  %v748_v42 = vsel %vm3174_vm9, %v2618_v43, %v742_v44  ;;  %v633_v24 = vsel %vm3175_vm5, %v626_v50, %v2750_v2  ;;  %vm2764_vm9 = vcmp.eq.s32.totalorder %v730_v22, 1  ;;  %v2773_v50 = vsel %vm2263_vm3, 1, %v1924_v16 }
  0xce   : > { %v756_v58 = vsel %vm2740_vm7, %v748_v42, 0.0  ;;  %v1286_v46 = vsel %vm2610_vm0, %v748_v42, 0.0  ;;  %v641_v23 = vsel %vm2744_vm1, %v633_v24, 0.0  ;;  %v1251_v10 = vsel %vm2717_vm2, %v633_v24, 0.0 }
  0xcf   : > { %760 = vst [vmem:[#allocation2 + $0x70] sm:$0xf] %v756_v58  ;;  %1290 = vst [vmem:[#allocation2 + $0x188] sm:$0xf] %v1286_v46  ;;  %vm3178_vm5 = vcmask 523264   ;;  %v830_v16 = vrot.slane %v2773_v50, %v2058_v12  ;;  %v834_v45 = vrot.slane %v2773_v50, %v2060_v13  ;;  %vm3065_vm3 = vcmask 900096  }
  0xd0   : > { %645 = vst [vmem:[#allocation2 + $0x58] sm:$0xf] %v641_v23  ;;  %1255 = vst [vmem:[#allocation2 + $0x170] sm:$0xf] %v1251_v10  ;;  %v875_v33 = vpop.permute.xlu1 %874  ;;  %v2768_v26 = vpop.permute.xlu0 %743  ;;  %v3181_v24 = vmov 0 }
  0xd1   : > { %v885_v4 = vsel %vm3178_vm5, %v875_v33, %v2686_v40  ;;  %v749_v0 = vsel %vm3179_vm8, %v742_v44, %v2768_v26  ;;  %vm2793_vm8 = vcmp.eq.s32.totalorder %v830_v16, 1  ;;  %vm2797_vm5 = vcmp.eq.s32.totalorder %v834_v45, 1 }
  0xd2   : > { %v893_v55 = vsel %vm2104_vm6, %v885_v4, 0.0  ;;  %v757_v5 = vsel %vm2764_vm9, %v749_v0, 0.0  ;;  %v1287_v54 = vsel %vm2740_vm7, %v749_v0, 0.0  ;;  %vm3180_vm6 = vcmask 506880   ;;  %v1340_v0 = vld [vmem:[#allocation2 + $0x50] sm:$0xff] }
  0xd3   : > { %v901_v31 = vrot.slane %v893_v55, 4  ;;  %761 = vst [vmem:[#allocation2 + $0x78] sm:$0xf] %v757_v5  ;;  %1291 = vst [vmem:[#allocation2 + $0x190] sm:$0xf] %v1287_v54  ;;  %v3182_v24 = vsel %vm2793_vm8, 4294967295, %v3181_v24 }
  0xd4   : > { %v850_v40 = vpop.permute.xlu1 %849  ;;  %v941_v22 = vpop.permute.xlu0 %940 }
  0xd5   : > { %909 = vst [vmem:[#allocation2 + $0x80] sm:$0xf0] %v901_v31  ;;  %v951_v25 = vsel %vm3180_vm6, %v941_v22, %v2704_v20  ;;  %vm3185_vm6 = vcmask 523264  }
  0xd6   : > { %v959_v44 = vsel %vm2355_vm11, %v951_v25, 0.0  ;;  %v1344_v46 = vld [vmem:[#allocation2 + $0x70] sm:$0xff]  ;;  %vm3066_vm11 = vcmask 515072   ;;  %vm3186_vm15 = vmmov %vm3185_vm6 }
  0xd7   : > { %v967_v42 = vrot.slane %v959_v44, 4  ;;  %v1341_v10 = vld [vmem:[#allocation2 + $0x58] sm:$0xff]  ;;  %v1827_v54 = vpack.c.bf16 %v1344_v46, %v1340_v0 }
  0xd8   : > { %v916_v13 = vpop.permute.xlu1 %915  ;;  %v2801_v58 = vpop.permute.xlu0 %851 }
  0xd9   : > { %975 = vst [vmem:[#allocation2 + $0xa0] sm:$0xf0] %v967_v42  ;;  %v859_v20 = vsel %vm3065_vm3, %v850_v40, %v2801_v58 }
  0xda   : > { %v867_v1 = vsel %vm2797_vm5, %v859_v20, 0.0  ;;  %v1321_v23 = vsel %vm2793_vm8, %v859_v20, 0.0  ;;  %v1345_v33 = vld [vmem:[#allocation2 + $0x78] sm:$0xff] }
  0xdb   : > { %871 = vst [vmem:[#allocation2 + $0x88] sm:$0xf] %v867_v1  ;;  %1325 = vst [vmem:[#allocation2 + $0x1a0] sm:$0xf] %v1321_v23  ;;  %v1825_v4 = vpack.c.bf16 %v1345_v33, %v1341_v10 }
  0xdc   : > { %v848_v55 = vpop.permute.xlu1 %847  ;;  %v2809_v5 = vpop.permute.xlu0 %917 }
  0xdd   : > { %v858_v31 = vsel %vm3065_vm3, %v848_v55, %v850_v40  ;;  %v925_v16 = vsel %vm3066_vm11, %v916_v13, %v2809_v5  ;;  %1826 = vmatprep.subr.bf16.mxu1 %v1825_v4  ;;  %vm3187_vm3 = vnez %v3082_v27  ;;  %vm3188_vm11 = vnez %v3086_v29 }
  0xde   : > { %v866_v45 = vsel %vm2793_vm8, %v858_v31, 0.0  ;;  %v933_v22 = vsel %vm2351_vm10, %v925_v16, 0.0  ;;  %1828 = vmatpush1.bf16.msra.mxu1 %v1827_v54  ;;  %vm3189_vm10 = vcmask 506880   ;;  %vm3190_vm8 = vcmask 515072  }
  0xdf   : > { %870 = vst [vmem:[#allocation2 + $0x80] sm:$0xf] %v866_v45  ;;  %937 = vst [vmem:[#allocation2 + $0xa8] sm:$0xf] %v933_v22 }
  0xe0   : > { %v883_v25 = vpop.permute.xlu1 %882  ;;  %v881_v44 = vpop.permute.xlu0 %880 }
  0xe1   : > { %v887_v42 = vsel %vm3185_vm6, %v2706_v21, %v881_v44  ;;  %v888_v40 = vsel %vm3186_vm15, %v881_v44, %v883_v25  ;;  %vm3191_vm6 = vnez %v3133_v3  ;;  %vm3192_vm15 = vnez %v3110_v61 }
  0xe2   : > { %v895_v20 = vsel %vm3187_vm3, %v887_v42, 0.0  ;;  %v896_v46 = vsel %vm3188_vm11, %v888_v40, 0.0  ;;  %v1347_v0 = vld [vmem:[#allocation2 + $0x88] sm:$0xff]  ;;  %vm3193_vm3 = vmmov %vm3189_vm10  ;;  %vm3194_vm11 = vnez %v3141_v41  ;;  %v838_v61 = vrot.slane %v2773_v50, %v2064_v14 }
  0xe3   : > { %v903_v1 = vrot.slane %v895_v20, 4  ;;  %v904_v23 = vrot.slane %v896_v46, 4  ;;  %v842_v14 = vrot.slane %v2773_v50, %v2072_v18 }
  0xe4   : > { %v947_v62 = vpop.permute.xlu1 %946  ;;  %v914_v10 = vpop.permute.xlu0 %913 }
  0xe5   : > { %911 = vst [vmem:[#allocation2 + $0x90] sm:$0xf0] %v903_v1  ;;  %912 = vst [vmem:[#allocation2 + $0x98] sm:$0xf0] %v904_v23  ;;  %v953_v33 = vsel %vm3189_vm10, %v2725_v34, %v947_v62  ;;  %v924_v4 = vsel %vm3190_vm8, %v914_v10, %v916_v13  ;;  %vm1016_vm8 = vcmask 449536   ;;  %vm3068_vm10 = vcmask 392192  }
  0xe6   : > { %v961_v21 = vsel %vm3191_vm6, %v953_v33, 0.0  ;;  %v932_v27 = vsel %vm3192_vm15, %v924_v4, 0.0  ;;  %v1351_v29 = vld [vmem:[#allocation2 + $0xa8] sm:$0xff]  ;;  %v1346_v42 = vld [vmem:[#allocation2 + $0x80] sm:$0xff]  ;;  %vm2843_vm6 = vcmp.eq.s32.totalorder %v838_v61, 1  ;;  %vm3197_vm15 = vcmask 900096  }
  0xe7   : > { %v969_v55 = vrot.slane %v961_v21, 4  ;;  %936 = vst [vmem:[#allocation2 + $0xa0] sm:$0xf] %v932_v27  ;;  %v1799_v54 = vpack.c.bf16 %v1351_v29, %v1347_v0 }
  0xe8   : > { %v1009_v31 = vpop.permute.xlu1 %1008  ;;  %v949_v16 = vpop.permute.xlu0 %948 }
  0xe9   : > { %977 = vst [vmem:[#allocation2 + $0xb0] sm:$0xf0] %v969_v55  ;;  %v954_v45 = vsel %vm3193_vm3, %v947_v62, %v949_v16  ;;  %1800 = vmatprep.subr.bf16.mxu0 %v1799_v54  ;;  %vm3200_vm3 = vcmask 515072  }
  0xea   : > { %v962_v34 = vsel %vm3194_vm11, %v954_v45, 0.0  ;;  %vm989_vm11 = vcmask 457728  }
  0xeb   : > { %v970_v3 = vrot.slane %v962_v34, 4 }
  0xec   : > { %v1075_v13 = vpop.permute.xlu1 %1074  ;;  %v2837_v22 = vpop.permute.xlu0 %1010 }
  0xed   : > { %978 = vst [vmem:[#allocation2 + $0xb8] sm:$0xf0] %v970_v3  ;;  %v1018_v25 = vsel %vm1016_vm8, %v1009_v31, %v2837_v22 }
  0xee   : > { %v1026_v44 = vsel %vm2582_vm13, %v1018_v25, 0.0  ;;  %v1350_v40 = vld [vmem:[#allocation2 + $0xa0] sm:$0xff]  ;;  %vm2861_vm13 = vcmp.eq.s32.totalorder %v842_v14, 1 }
  0xef   : > { %v1034_v20 = vrot.slane %v1026_v44, 4  ;;  %v1801_v1 = vpack.c.bf16 %v1350_v40, %v1346_v42 }
  0xf0   : > { %v854_v23 = vpop.permute.xlu1 %853  ;;  %v2849_v62 = vpop.permute.xlu0 %1076 }
  0xf1   : > { %1042 = vst [vmem:[#allocation2 + $0xc8] sm:$0xf0] %v1034_v20  ;;  %v860_v47 = vsel %vm3197_vm15, %v2801_v58, %v854_v23  ;;  %v1084_v10 = vsel %vm3068_vm10, %v1075_v13, %v2849_v62  ;;  %1802 = vmatpush1.bf16.msra.mxu0 %v1801_v1  ;;  %vm3201_vm10 = vnez %v3118_v49 }
  0xf2   : > { %v868_v33 = vsel %vm2843_vm6, %v860_v47, 0.0  ;;  %v1322_v4 = vsel %vm2797_vm5, %v860_v47, 0.0  ;;  %v1092_v18 = vsel %vm2610_vm0, %v1084_v10, 0.0  ;;  %vm3202_vm0 = vmmov %vm3200_vm3 }
  0xf3   : > { %872 = vst [vmem:[#allocation2 + $0x90] sm:$0xf] %v868_v33  ;;  %1326 = vst [vmem:[#allocation2 + $0x1a8] sm:$0xf] %v1322_v4  ;;  %v1100_v50 = vrot.slane %v1092_v18, 4 }
  0xf4   : > { %v920_v58 = vpop.permute.xlu1 %919  ;;  %v2865_v27 = vpop.permute.xlu0 %855 }
  0xf5   : > { %1108 = vst [vmem:[#allocation2 + $0xe8] sm:$0xf0] %v1100_v50  ;;  %v926_v0 = vsel %vm3200_vm3, %v2809_v5, %v920_v58  ;;  %v861_v29 = vsel %vm3197_vm15, %v854_v23, %v2865_v27  ;;  %vm3203_vm3 = vnez %v3146_v28  ;;  %vm3205_vm15 = vcmask 392192  }
  0xf6   : > { %v934_v56 = vsel %vm3201_vm10, %v926_v0, 0.0  ;;  %v869_v55 = vsel %vm2861_vm13, %v861_v29, 0.0  ;;  %v1323_v54 = vsel %vm2843_vm6, %v861_v29, 0.0  ;;  %vm3204_vm10 = vnez %v3120_v51  ;;  %v1375_v51 = vld [vmem:[#allocation2 + $0x168] sm:$0xff] }
  0xf7   : > { %938 = vst [vmem:[#allocation2 + $0xb0] sm:$0xf] %v934_v56  ;;  %873 = vst [vmem:[#allocation2 + $0x98] sm:$0xf] %v869_v55 }
  0xf8   : > { %1327 = vst [vmem:[#allocation2 + $0x1b0] sm:$0xf] %v1323_v54  ;;  %v1007_v16 = vpop.permute.xlu1 %1006  ;;  %v922_v45 = vpop.permute.xlu0 %921 }
  0xf9   : > { %v1017_v34 = vsel %vm1016_vm8, %v1007_v16, %v1009_v31  ;;  %v927_v5 = vsel %vm3202_vm0, %v920_v58, %v922_v45  ;;  %vm3206_vm0 = vnez %v3108_v60 }
  0xfa   : > { %v1025_v3 = vsel %vm3203_vm3, %v1017_v34, 0.0  ;;  %v935_v49 = vsel %vm3204_vm10, %v927_v5, 0.0  ;;  %vm1055_vm3 = vcmask 441344  }
  0xfb   : > { %v1033_v61 = vrot.slane %v1025_v3, 4  ;;  %939 = vst [vmem:[#allocation2 + $0xb8] sm:$0xf] %v935_v49 }
  0xfc   : > { %v982_v25 = vpop.permute.xlu1 %981  ;;  %v1073_v44 = vpop.permute.xlu0 %1072 }
  0xfd   : > { %1041 = vst [vmem:[#allocation2 + $0xc0] sm:$0xf0] %v1033_v61  ;;  %v1083_v42 = vsel %vm3205_vm15, %v1073_v44, %v1075_v13  ;;  %v1348_v13 = vld [vmem:[#allocation2 + $0x90] sm:$0xff] }
  0xfe   : > { %v1091_v40 = vsel %vm2602_vm4, %v1083_v42, 0.0  ;;  %v1352_v14 = vld [vmem:[#allocation2 + $0xb0] sm:$0xff]  ;;  %v1349_v47 = vld [vmem:[#allocation2 + $0x98] sm:$0xff]  ;;  %vm3207_vm4 = vnez %v3106_v59 }
  0xff   : > { %v1099_v31 = vrot.slane %v1091_v40, 4  ;;  %v1831_v18 = vpack.c.bf16 %v1352_v14, %v1348_v13 }
 0x100   : > { %v1048_v20 = vpop.permute.xlu1 %1047  ;;  %v984_v1 = vpop.permute.xlu0 %983 }
 0x101   : > { %1107 = vst [vmem:[#allocation2 + $0xe0] sm:$0xf0] %v1099_v31  ;;  %v991_v28 = vsel %vm989_vm11, %v982_v25, %v984_v1 }
 0x102   : > { %v999_v23 = vsel %vm3206_vm0, %v991_v28, 0.0  ;;  %v1353_v10 = vld [vmem:[#allocation2 + $0xb8] sm:$0xff]  ;;  %vm3212_vm0 = vnez %v3126_v17 }
 0x103   : > { %1003 = vst [vmem:[#allocation2 + $0xc8] sm:$0xf] %v999_v23  ;;  %v1829_v33 = vpack.c.bf16 %v1353_v10, %v1349_v47 }
 0x104   : > { %v980_v4 = vpop.permute.xlu1 %979  ;;  %v1050_v38 = vpop.permute.xlu0 %1049 }
 0x105   : > { %v990_v50 = vsel %vm989_vm11, %v980_v4, %v982_v25  ;;  %v1057_v58 = vsel %vm1055_vm3, %v1048_v20, %v1050_v38  ;;  %1830 = vmatprep.subr.bf16.mxu1 %v1829_v33 }
 0x106   : > { %v998_v0 = vsel %vm3207_vm4, %v990_v50, 0.0  ;;  %v1065_v60 = vsel %vm2488_vm12, %v1057_v58, 0.0  ;;  %1832 = vmatpush1.bf16.msra.mxu1 %v1831_v18  ;;  %vm3208_vm12 = vmmov %vm3205_vm15  ;;  %vm1148_vm15 = vcmask 375808   ;;  %vm1121_vm4 = vcmask 384000  }
 0x107   : > { %1002 = vst [vmem:[#allocation2 + $0xc0] sm:$0xf] %v998_v0  ;;  %1069 = vst [vmem:[#allocation2 + $0xe8] sm:$0xf] %v1065_v60 }
 0x108   : > { %v1015_v29 = vpop.permute.xlu1 %1014  ;;  %v1013_v56 = vpop.permute.xlu0 %1012 }
 0x109   : > { %v1019_v55 = vsel %vm1016_vm8, %v2837_v22, %v1013_v56  ;;  %v1020_v54 = vsel %vm1016_vm8, %v1013_v56, %v1015_v29  ;;  %vm3209_vm8 = vnez %v3129_v63 }
 0x10a   : > { %v1027_v16 = vsel %vm2717_vm2, %v1019_v55, 0.0  ;;  %v1028_v59 = vsel %vm2744_vm1, %v1020_v54, 0.0  ;;  %v1355_v61 = vld [vmem:[#allocation2 + $0xc8] sm:$0xff]  ;;  %vm3210_vm2 = vmmov %vm3208_vm12 }
 0x10b   : > { %v1035_v45 = vrot.slane %v1027_v16, 4  ;;  %v1036_v34 = vrot.slane %v1028_v59, 4 }
 0x10c   : > { %v1079_v48 = vpop.permute.xlu1 %1078  ;;  %v1046_v5 = vpop.permute.xlu0 %1045 }
 0x10d   : > { %1043 = vst [vmem:[#allocation2 + $0xd0] sm:$0xf0] %v1035_v45  ;;  %1044 = vst [vmem:[#allocation2 + $0xd8] sm:$0xf0] %v1036_v34  ;;  %v1085_v3 = vsel %vm3208_vm12, %v2849_v62, %v1079_v48  ;;  %v1056_v49 = vsel %vm1055_vm3, %v1046_v5, %v1048_v20  ;;  %vm3217_vm12 = vcmask 1039360  }
 0x10e   : > { %v1093_v22 = vsel %vm2740_vm7, %v1085_v3, 0.0  ;;  %v1064_v32 = vsel %vm3209_vm8, %v1056_v49, 0.0  ;;  %v1359_v25 = vld [vmem:[#allocation2 + $0xe8] sm:$0xff]  ;;  %vm3211_vm7 = vnez %v3122_v57  ;;  %v1354_v33 = vld [vmem:[#allocation2 + $0xc0] sm:$0xff]  ;;  %vm1390_vm8 = vcmask 1043456  }
 0x10f   : > { %v1101_v44 = vrot.slane %v1093_v22, 4  ;;  %1068 = vst [vmem:[#allocation2 + $0xe0] sm:$0xf] %v1064_v32  ;;  %v1803_v42 = vpack.c.bf16 %v1359_v25, %v1355_v61 }
 0x110   : > { %v1141_v40 = vpop.permute.xlu1 %1140  ;;  %v1081_v31 = vpop.permute.xlu0 %1080 }
 0x111   : > { %1109 = vst [vmem:[#allocation2 + $0xf0] sm:$0xf0] %v1101_v44  ;;  %v1086_v28 = vsel %vm3210_vm2, %v1079_v48, %v1081_v31  ;;  %1804 = vmatprep.subr.bf16.mxu0 %v1803_v42  ;;  %vm3220_vm2 = vcmask 965632  }
 0x112   : > { %v1094_v62 = vsel %vm2764_vm9, %v1086_v28, 0.0 }
 0x113   : > { %v1102_v35 = vrot.slane %v1094_v62, 4 }
 0x114   : > { %v986_v20 = vpop.permute.xlu1 %985  ;;  %v1143_v14 = vpop.permute.xlu0 %1142 }
 0x115   : > { %1110 = vst [vmem:[#allocation2 + $0xf8] sm:$0xf0] %v1102_v35  ;;  %v992_v63 = vsel %vm989_vm11, %v984_v1, %v986_v20  ;;  %v1150_v23 = vsel %vm1148_vm15, %v1141_v40, %v1143_v14 }
 0x116   : > { %v1000_v47 = vsel %vm3211_vm7, %v992_v63, 0.0  ;;  %v1158_v10 = vsel %vm2797_vm5, %v1150_v23, 0.0  ;;  %v1358_v13 = vld [vmem:[#allocation2 + $0xe0] sm:$0xff]  ;;  %vm3213_vm5 = vnez %v3182_v24  ;;  %vm1941_vm7 = vmmov 1  }
 0x117   : > { %1004 = vst [vmem:[#allocation2 + $0xd0] sm:$0xf] %v1000_v47  ;;  %v1166_v4 = vrot.slane %v1158_v10, 4  ;;  %v1805_v18 = vpack.c.bf16 %v1358_v13, %v1354_v33 }
 0x118   : > { %v1052_v50 = vpop.permute.xlu1 %1051 }
 0x119   : > { %v988_v58 = vpop.permute.xlu0 %987  ;;  %1174 = vst [vmem:[#allocation2 + $0x108] sm:$0xf0] %v1166_v4  ;;  %v1058_v0 = vsel %vm1055_vm3, %v1050_v38, %v1052_v50  ;;  %1806 = vmatpush1.bf16.msra.mxu0 %v1805_v18 }
 0x11a   : > { %v993_v1 = vsel %vm989_vm11, %v986_v20, %v988_v58  ;;  %v1066_v57 = vsel %vm2636_vm14, %v1058_v0, 0.0  ;;  %vm3214_vm11 = vnez %v3157_v30  ;;  %vm3215_vm14 = vnez %v3137_v7  ;;  %v1366_v58 = vld [vmem:[#allocation2 + $0x120] sm:$0xff] }
 0x11b   : > { %v1001_v12 = vsel %vm3212_vm0, %v993_v1, 0.0  ;;  %1070 = vst [vmem:[#allocation2 + $0xf0] sm:$0xf] %v1066_v57  ;;  %v1371_v1 = vld [vmem:[#allocation2 + $0x148] sm:$0xff] }
 0x11c   : > { %1005 = vst [vmem:[#allocation2 + $0xd8] sm:$0xf] %v1001_v12  ;;  %v1139_v60 = vpop.permute.xlu1 %1138 }
 0x11d   : > { %v1054_v29 = vpop.permute.xlu0 %1053  ;;  %v1149_v56 = vsel %vm1148_vm15, %v1139_v60, %v1141_v40  ;;  %v1811_v60 = vpack.c.bf16 %v1375_v51, %v1371_v1 }
 0x11e   : > { %v1059_v55 = vsel %vm1055_vm3, %v1052_v50, %v1054_v29  ;;  %v1157_v38 = vsel %vm3213_vm5, %v1149_v56, 0.0  ;;  %vm3216_vm3 = vnez %v3135_v6  ;;  %v1356_v42 = vld [vmem:[#allocation2 + $0xd0] sm:$0xff]  ;;  %v1374_v29 = vld [vmem:[#allocation2 + $0x160] sm:$0xff]  ;;  %vm2960_vm5 = vmpackc.low %vm1390_vm8, %vm1941_vm7 }
 0x11f   : > { %v1067_v54 = vsel %vm3214_vm11, %v1059_v55, 0.0  ;;  %v1165_v19 = vrot.slane %v1157_v38, 4  ;;  %v1383_v55 = vld [vmem:[#allocation2 + $0x1a8] sm:$0xf] }
 0x120   : > { %1071 = vst [vmem:[#allocation2 + $0xf8] sm:$0xf] %v1067_v54  ;;  %v1116_v16 = vpop.permute.xlu1 %1115 }
 0x121   : > { %v1114_v59 = vpop.permute.xlu0 %1113  ;;  %1173 = vst [vmem:[#allocation2 + $0x100] sm:$0xf0] %v1165_v19  ;;  %v1370_v19 = vld [vmem:[#allocation2 + $0x140] sm:$0xff] }
 0x122   : > { %v1123_v45 = vsel %vm1121_vm4, %v1114_v59, %v1116_v16  ;;  %v1360_v49 = vld [vmem:[#allocation2 + $0xf0] sm:$0xff] }
 0x123   : > { %v1131_v34 = vsel %vm3215_vm14, %v1123_v45, 0.0  ;;  %v1357_v61 = vld [vmem:[#allocation2 + $0xd8] sm:$0xff]  ;;  %v1835_v28 = vpack.c.bf16 %v1360_v49, %v1356_v42  ;;  %v1813_v45 = vpack.c.bf16 %v1374_v29, %v1370_v19  ;;  %v1368_v49 = vld [vmem:[#allocation2 + $0x130] sm:$0xff]  ;;  %vm3227_vm14 = vcmask 916480  }
 0x124   : > { %1135 = vst [vmem:[#allocation2 + $0x108] sm:$0xf] %v1131_v34  ;;  %v1145_v48 = vpop.permute.xlu1 %1144  ;;  %v1379_v34 = vld [vmem:[#allocation2 + $0x188] sm:$0xff] }
 0x125   : > { %v1112_v5 = vpop.permute.xlu0 %1111  ;;  %v1151_v24 = vsel %vm1148_vm15, %v1143_v14, %v1145_v48  ;;  %v1367_v14 = vld [vmem:[#allocation2 + $0x128] sm:$0xff] }
 0x126   : > { %v1122_v3 = vsel %vm1121_vm4, %v1112_v5, %v1114_v59  ;;  %v1159_v22 = vsel %vm2843_vm6, %v1151_v24, 0.0  ;;  %vm3218_vm6 = vnez %v3161_v39  ;;  %v1815_v5 = vpack.c.bf16 %v1383_v55, %v1379_v34  ;;  %v1382_v24 = vld [vmem:[#allocation2 + $0x1a0] sm:$0xf] }
 0x127   : > { %v1130_v32 = vsel %vm3216_vm3, %v1122_v3, 0.0  ;;  %v1361_v25 = vld [vmem:[#allocation2 + $0xf8] sm:$0xff]  ;;  %v1167_v44 = vrot.slane %v1159_v22, 4  ;;  %v1378_v3 = vld [vmem:[#allocation2 + $0x180] sm:$0xff]  ;;  %vm1386_vm3 = vcmask 883712  }
 0x128   : > { %1134 = vst [vmem:[#allocation2 + $0x100] sm:$0xf] %v1130_v32  ;;  %v1833_v7 = vpack.c.bf16 %v1361_v25, %v1357_v61  ;;  %v1186_v40 = vpop.permute.xlu1 %1185 }
 0x129   : > { %v1147_v31 = vpop.permute.xlu0 %1146  ;;  %1175 = vst [vmem:[#allocation2 + $0x110] sm:$0xf0] %v1167_v44  ;;  %v1187_v62 = vsel %vm3217_vm12, %v2411_v52, %v1186_v40  ;;  %vm3229_vm12 = vcmask 900096  }
 0x12a   : > { %v1152_v35 = vsel %vm1148_vm15, %v1145_v48, %v1147_v31  ;;  %1834 = vmatprep.subr.bf16.mxu1 %v1833_v7  ;;  %v1192_v6 = vsel %vm3204_vm10, %v1187_v62, 0.0  ;;  %vm3219_vm10 = vnez %v3165_v8  ;;  %vm3221_vm15 = vcmask 982016   ;;  %v1329_v31 = vld [vmem:[%s3025_s2] sm:$0xff] }
 0x12b   : > { %v1160_v46 = vsel %vm2861_vm13, %v1152_v35, 0.0  ;;  %1836 = vmatpush1.bf16.msra.mxu1 %v1835_v28  ;;  %v1363_v20 = vld [vmem:[#allocation2 + $0x108] sm:$0xff]  ;;  %v1200_v63 = vrot.slane %v1192_v6, 4  ;;  %v1376_v6 = vld [vmem:[#allocation2 + $0x170] sm:$0xff] }
 0x12c   : > { %v1168_v23 = vrot.slane %v1160_v46, 4  ;;  %v1807_v47 = vpack.c.bf16 %v1367_v14, %v1363_v20  ;;  %v1120_v10 = vpop.permute.xlu1 %1119  ;;  %v1372_v14 = vld [vmem:[#allocation2 + $0x150] sm:$0xff] }
 0x12d   : > { %v1118_v33 = vpop.permute.xlu0 %1117  ;;  %1208 = vst [vmem:[#allocation2 + $0x138] sm:$0xf0] %v1200_v63  ;;  %v1843_v63 = vpack.c.bf16 %v1376_v6, %v1372_v14 }
 0x12e   : > { %1176 = vst [vmem:[#allocation2 + $0x118] sm:$0xf0] %v1168_v23  ;;  %v1124_v52 = vsel %vm1121_vm4, %v1116_v16, %v1118_v33  ;;  %v1125_v13 = vsel %vm1121_vm4, %v1118_v33, %v1120_v10  ;;  %1808 = vmatprep.subr.bf16.mxu0 %v1807_v47  ;;  %vm3226_vm4 = vnez %v3141_v41  ;;  %v1384_v23 = vld [vmem:[#allocation2 + $0x1b0] sm:$0xf] }
 0x12f   : > { %v1132_v4 = vsel %vm3218_vm6, %v1124_v52, 0.0  ;;  %v1133_v18 = vsel %vm3219_vm10, %v1125_v13, 0.0  ;;  %v1362_v50 = vld [vmem:[#allocation2 + $0x100] sm:$0xff]  ;;  %v1380_v52 = vld [vmem:[#allocation2 + $0x190] sm:$0xff] }
 0x130   : > { %1136 = vst [vmem:[#allocation2 + $0x110] sm:$0xf] %v1132_v4  ;;  %1137 = vst [vmem:[#allocation2 + $0x118] sm:$0xf] %v1133_v18  ;;  %v1809_v0 = vpack.c.bf16 %v1366_v58, %v1362_v50  ;;  %v1258_v57 = vpop.permute.xlu1 %1257 }
 0x131   : > { %v1222_v12 = vpop.permute.xlu0 %1221  ;;  %v1259_v56 = vsel %vm3220_vm2, %v2644_v15, %v1258_v57 }
 0x132   : > { %v1223_v39 = vsel %vm3221_vm15, %v2466_v37, %v1222_v12  ;;  %1810 = vmatpush1.bf16.msra.mxu0 %v1809_v0  ;;  %v1264_v38 = vsel %vm3214_vm11, %v1259_v56, 0.0  ;;  %vm3224_vm11 = vcmask 973824  }
 0x133   : > { %v1228_v54 = vsel %vm3212_vm0, %v1223_v39, 0.0  ;;  %1812 = vmatprep.subr.bf16.mxu0 %v1811_v60  ;;  %v1272_v16 = vrot.slane %v1264_v38, 4  ;;  %vm3225_vm0 = vcmask 1031168  }
 0x134   : > { %v1236_v59 = vrot.slane %v1228_v54, 4  ;;  %v1246_v37 = vpop.permute.xlu1 %1245  ;;  %v1369_v25 = vld [vmem:[#allocation2 + $0x138] sm:$0xff] }
 0x135   : > { %v1210_v48 = vpop.permute.xlu0 %1209  ;;  %1280 = vst [vmem:[#allocation2 + $0x178] sm:$0xf0] %v1272_v16  ;;  %v1247_v17 = vsel %vm3224_vm11, %v2750_v2, %v1246_v37  ;;  %v1818_v2 = vpack.c.bf16 %v1382_v24, %v1378_v3 }
 0x136   : > { %1244 = vst [vmem:[#allocation2 + $0x158] sm:$0xf0] %v1236_v59  ;;  %v1211_v30 = vsel %vm3225_vm0, %v2540_v53, %v1210_v48  ;;  %1814 = vmatpush1.bf16.msra.mxu0 %v1813_v45  ;;  %v1252_v22 = vsel %vm2744_vm1, %v1247_v17, 0.0  ;;  %vm3228_vm1 = vcmask 908288  }
 0x137   : > { %v1216_v32 = vsel %vm3226_vm4, %v1211_v30, 0.0  ;;  %1817 = vmatprep.subr.msk.bf16.mxu0 %vm2960_vm5, %v1815_v5  ;;  %v1365_v61 = vld [vmem:[#allocation2 + $0x118] sm:$0xff]  ;;  %v1364_v44 = vld [vmem:[#allocation2 + $0x110] sm:$0xff]  ;;  %1256 = vst [vmem:[#allocation2 + $0x178] sm:$0xf] %v1252_v22 }
 0x138   : > { %1220 = vst [vmem:[#allocation2 + $0x158] sm:$0xf] %v1216_v32  ;;  %v1837_v7 = vpack.c.bf16 %v1369_v25, %v1365_v61  ;;  %v1839_v53 = vpack.c.bf16 %v1368_v49, %v1364_v44  ;;  %v1282_v42 = vpop.permute.xlu1 %1281 }
 0x139   : > { %v1294_v40 = vpop.permute.xlu0 %1293  ;;  %v1283_v36 = vsel %vm3227_vm14, %v2768_v26, %v1282_v42 }
 0x13a   : > { %v1295_v41 = vsel %vm3228_vm1, %v2688_v11, %v1294_v40  ;;  %1820 = vmatpush1.bf16.msk.msra.mxu0 %vm2960_vm5, %v1818_v2  ;;  %1838 = vmatprep.subr.bf16.mxu1 %v1837_v7  ;;  %v1288_v28 = vsel %vm2764_vm9, %v1283_v36, 0.0  ;;  %vm359_vm9 = vcmask 7168  }
 0x13b   : > { %v1300_v62 = vsel %vm3219_vm10, %v1295_v41, 0.0  ;;  %1840 = vmatpush1.bf16.msra.mxu1 %v1839_v53  ;;  %1292 = vst [vmem:[#allocation2 + $0x198] sm:$0xf] %v1288_v28  ;;  %360 = vst.msk [vmem:[%s350_s16] sm:$0xff] %vm359_vm9, %v1940_v9 }
 0x13c   : > { %v1308_v26 = vrot.slane %v1300_v62, 4  ;;  %361 = vst.msk [vmem:[%s354_s20] sm:$0xff] %vm359_vm9, %v1940_v9 }
 0x13d   : > { %v1318_v35 = vpop.permute.xlu0 %1317  ;;  %1780 = vmatmul.mubr.msk.f32.vlgmr.msra.gmra.mrb[0].mxu0 %vm1386_vm3, %v1329_v31 }
 0x13e   : > { %1316 = vst [vmem:[#allocation2 + $0x198] sm:$0xf0] %v1308_v26  ;;  %v1319_v11 = vsel %vm3229_vm12, %v2865_v27, %v1318_v35  ;;  %v1377_v43 = vld [vmem:[#allocation2 + $0x178] sm:$0xff]  ;;  %v1848_v27 = vpack.c.bf16 %v1384_v23, %v1380_v52 }
 0x13f   : > { %v1324_v46 = vsel %vm2861_vm13, %v1319_v11, 0.0  ;;  %v1373_v20 = vld [vmem:[#allocation2 + $0x158] sm:$0xff] }
 0x140   : > { %1328 = vst [vmem:[#allocation2 + $0x1b8] sm:$0xf] %v1324_v46  ;;  %v1841_v8 = vpack.c.bf16 %v1377_v43, %v1373_v20 }
 0x142   : > { %1842 = vmatprep.subr.bf16.mxu1 %v1841_v8  ;;  %v1576_v39 = vld [vmem:[%s350_s16] sm:$0xff] }
 0x143   : > { %1844 = vmatpush1.bf16.msra.mxu1 %v1843_v63  ;;  %v1585_v38 = vld [vmem:[%s354_s20] sm:$0xff] }
 0x145   : > { %v1381_v47 = vld [vmem:[#allocation2 + $0x198] sm:$0xff] }
 0x147   : > { %v1385_v10 = vld [vmem:[#allocation2 + $0x1b8] sm:$0xf] }
 0x148   : > { %v1845_v33 = vpack.c.bf16 %v1385_v10, %v1381_v47 }
 0x14a   : > { %1847 = vmatprep.subr.msk.bf16.mxu1 %vm2960_vm5, %v1845_v33 }
 0x14b   : > { %1850 = vmatpush1.bf16.msk.msra.mxu1 %vm2960_vm5, %v1848_v27 }
 0x14e   : > { %1783 = vmatmul.mubr.msk.f32.vlgmr.msra.gmra.mrb[0].mxu1 %vm1386_vm3, %v1329_v31 }
 0x210   : > { %v1469_v21 = vpop.f32.mrb[0].mxu0 }
 0x211   : > { %1572 = vst [vmem:[%s345_s19] sm:$0xff] %v1469_v21  ;;  %v1586_v13 = vmul.f32 %v1469_v21, %v1469_v21  ;;  %v1471_v51 = vpop.f32.mrb[1].mxu0 }
 0x212   : > { %1573 = vst [vmem:[%s345_s19 + $0x8] sm:$0xff] %v1471_v51  ;;  %v1577_v4 = vadd.f32 %v1471_v51, %v1469_v21  ;;  %v1587_v18 = vmul.f32 %v1471_v51, %v1471_v51 }
 0x214   : > { %v1590_v50 = vadd.f32 %v1587_v18, %v1586_v13 }
 0x221   : > { %v1540_v58 = vpop.f32.mrb[0].mxu1 }
 0x222   : > { %1574 = vst [vmem:[%s345_s19 + $0x10] sm:$0xff] %v1540_v58  ;;  %v1588_v0 = vmul.f32 %v1540_v58, %v1540_v58  ;;  %v1542_v1 = vpop.f32.mrb[1].mxu1  ;;  %v1578_v57 = vadd.f32 %v1577_v4, %v1540_v58 }
 0x223   : > { %1575 = vst [vmem:[%s345_s19 + $0x18] sm:$0xff] %v1542_v1  ;;  %v1589_v12 = vmul.f32 %v1542_v1, %v1542_v1 }
 0x224   : > { %v1579_v60 = vadd.f32 %v1578_v57, %v1542_v1  ;;  %v1591_v29 = vadd.f32 %v1590_v50, %v1588_v0 }
 0x226   : > { %1580 = vadd.xlane.f32.xlu1 %v1579_v60  ;;  %v1592_v56 = vadd.f32 %v1591_v29, %v1589_v12 }
 0x228   : > { %1593 = vadd.xlane.f32.xlu0 %v1592_v56 }
 0x2b3   : > { %v1581_v55 = vpop.xlane.xlu1 %1580 }
 0x2b4   : > { %v1582_v54 = vadd.f32 %v1581_v55, %v1576_v39 }
 0x2b5   : > { %v1594_v19 = vpop.xlane.xlu0 %1593 }
 0x2b6   : > { %1584 = vst.msk [vmem:[%s350_s16] sm:$0xff] %vm359_vm9, %v1582_v54  ;;  %v1595_v16 = vadd.f32 %v1594_v19, %v1585_v38 }
 0x2b8   : > { %1596 = vst.msk [vmem:[%s354_s20] sm:$0xff] %vm359_vm9, %v1595_v16 }
 0x2b9 PF: > { %s17_s23 = sadd.s32 1, %s1920_s23   ;;  %s3230_s21 = smov %s1916_s22 }
 0x2ba   : > { %p14_p5 = scmp.ge.s32.totalorder %s17_s23, 4   ;;  %s3231_s22 = smov %s3233_s24 }
 0x2bc   :  { %16 = sbr.rel (!%p14_p5) target bundleno = 2 (0x2), region = 98 }

</bundles_post_ra>
